<compile_context>
chip_gen: v7x
topology: tpu7x:2x2x1
jax: 0.10.0
libtpu: 0.0.40
codegen_flags: <defaults>
</compile_context>

<pallas_src>
import jax
import jax.numpy as jnp
from jax.experimental import pallas as pl
from jax.experimental.pallas import tpu as pltpu

FC1_NEURONS = 64
NUM_CLASSES = 47
PADDED_CLASSES = 128          # fc2 classes padded to one full lane group

BATCH_ALIGN = 16              # batch padded up to a multiple of this
CONV1_TARGET_COLS = 8192      # per-kernel column-tile targets (lanes)
CONV2_TARGET_COLS = 4096
FC_TILE_CAP = 1024
VMEM_LIMIT_BYTES = 32 * 1024 * 1024   # safe on v5e/v6e/v7x; covers conv2 tile


# ----------------------------- Pallas kernels ------------------------------

def _conv_pool_relu_kernel(p_ref, w_ref, b_ref, o_ref):
    """Fused conv (as matmul) + 2x2 max-pool + bias + ReLU.

    p_ref: (4, K, Nt) bf16  im2col patches; leading axis = 2x2 pooling phase.
    w_ref: (Cout, K)  bf16  repacked conv weights.
    b_ref: (Cout, 1)  f32   bias.
    o_ref: (Cout, Nt) bf16  pooled+ReLU output, columns ordered (b, ph, pw).
    """
    w = w_ref[...]
    y = jnp.dot(w, p_ref[0], preferred_element_type=jnp.float32)
    for d in range(1, 4):
        y = jnp.maximum(
            y, jnp.dot(w, p_ref[d], preferred_element_type=jnp.float32))
    # Per-channel bias add and ReLU commute with the max over the 2x2 window.
    o_ref[...] = jnp.maximum(y + b_ref[...], 0.0).astype(o_ref.dtype)


def _fc_fused_kernel(x_ref, w1_ref, b1_ref, w2_ref, b2_ref, o_ref):
    """Fused fc1 + ReLU + fc2 + log_softmax (classes padded to 128 lanes)."""
    h = jnp.dot(x_ref[...], w1_ref[...],
                preferred_element_type=jnp.float32) + b1_ref[...]
    h = jnp.maximum(h, 0.0)                       # fc1 activation stays in VMEM
    # TODO(synk): F.dropout / nn.Dropout2d are identity in eval mode; stochastic
    # training-mode dropout is not implemented.
    y = jnp.dot(h.astype(jnp.bfloat16), w2_ref[...],
                preferred_element_type=jnp.float32) + b2_ref[...]
    m = jnp.max(y, axis=-1, keepdims=True)
    s = jnp.sum(jnp.exp(y - m), axis=-1, keepdims=True)
    o_ref[...] = y - m - jnp.log(s)


# ------------------------------ tiling helpers ------------------------------

def _conv_batch_tile(batch, cols_per_sample, target_cols):
    """Largest batch tile (divisor of `batch`) whose column block is a multiple
    of 128 lanes and at most `target_cols` wide.  If the whole batch fits one
    aligned block, prefer splitting in two so v7x's second TensorCore gets work
    (grid axes marked "parallel" are sharded across TCs).  Falls back to the
    whole batch (full-array blocks are always legal)."""
    aligned = [bt for bt in range(1, batch + 1)
               if batch % bt == 0
               and (bt * cols_per_sample) % 128 == 0
               and bt * cols_per_sample <= target_cols]
    if not aligned:
        return batch
    bt = max(aligned)
    if bt == batch:
        smaller = [b for b in aligned if b <= batch // 2]
        if smaller:
            bt = max(smaller)
    return bt


def _fc_batch_tile(batch, cap=FC_TILE_CAP):
    """Largest multiple-of-16 divisor of `batch` at most `cap`; prefers >=2
    blocks when the whole batch would otherwise be a single block."""
    cands = [bt for bt in range(1, min(batch, cap) + 1)
             if batch % bt == 0 and bt % 16 == 0]
    if not cands:
        return batch
    bt = max(cands)
    if bt == batch:
        smaller = [b for b in cands if b <= batch // 2]
        if smaller:
            bt = max(smaller)
    return bt


# ------------------------------- glue / ops --------------------------------

def _im2col_pool_phases(x, k):
    """x: (Cin, B, H, W) channel-major -> bf16 patches (4, K, B*PH*PW).

    Leading axis is the 2x2 pooling phase (dh, dw); rows are ordered
    (kh, kw, ci) to match the repacked weights; columns are ordered
    (b, ph, pw).  Column j of phase (dh, dw) is the conv-input patch for
    output pixel (2*ph + dh, 2*pw + dw), so a max over the phase axis of
    W @ P[d] is exactly max_pool2d(conv2d(x, W), 2).
    """
    x = x.astype(jnp.bfloat16)            # cast before the slice/stack glue
    Cin, B, H, W = x.shape
    OH, OW = H - k + 1, W - k + 1
    PH, PW = OH // 2, OW // 2
    phases = []
    for dh in range(2):
        for dw in range(2):
            taps = []
            for kh in range(k):
                for kw in range(k):
                    r0, c0 = dh + kh, dw + kw
                    taps.append(jax.lax.slice(
                        x, (0, 0, r0, c0),
                        (Cin, B, r0 + 2 * PH - 1, c0 + 2 * PW - 1),
                        (1, 1, 2, 2)))                  # (Cin, B, PH, PW)
            t = jnp.stack(taps, axis=0)                 # (k*k, Cin, B, PH, PW)
            phases.append(t.reshape(k * k * Cin, B * PH * PW))
    return jnp.stack(phases, axis=0), PH, PW            # (4, K, B*PH*PW)


def conv_pool_relu(x_cmajor, w2d, bias, k, target_cols):
    """relu(max_pool2d(conv2d(x, w) + b, 2)) as one fused Pallas kernel.

    x_cmajor: (Cin, B, H, W).  Returns ((Cout, B*PH*PW) bf16, PH, PW) with
    columns ordered (b, ph, pw) — channel-major, so it reshapes directly to
    (Cout, B, PH, PW) for the next conv layer (no transpose)."""
    B = x_cmajor.shape[1]
    patches, PH, PW = _im2col_pool_phases(x_cmajor, k)
    cout, K = w2d.shape
    n_cols = B * PH * PW
    bt_cols = _conv_batch_tile(B, PH * PW, target_cols) * PH * PW
    out = pl.pallas_call(
        _conv_pool_relu_kernel,
        out_shape=jax.ShapeDtypeStruct((cout, n_cols), jnp.bfloat16),
        grid=(n_cols // bt_cols,),
        in_specs=[
            pl.BlockSpec((4, K, bt_cols), lambda i: (0, 0, i)),
            pl.BlockSpec((cout, K), lambda i: (0, 0)),
            pl.BlockSpec((cout, 1), lambda i: (0, 0)),
        ],
        out_specs=pl.BlockSpec((cout, bt_cols), lambda i: (0, i)),
        compiler_params=pltpu.CompilerParams(
            dimension_semantics=("parallel",),
            vmem_limit_bytes=VMEM_LIMIT_BYTES),
    )(patches, w2d, bias)
    return out, PH, PW


def _fc_block(xf, w1, b1, w2, b2):
    B, F = xf.shape
    bt = _fc_batch_tile(B)
    return pl.pallas_call(
        _fc_fused_kernel,
        out_shape=jax.ShapeDtypeStruct((B, PADDED_CLASSES), jnp.float32),
        grid=(B // bt,),
        in_specs=[
            pl.BlockSpec((bt, F), lambda i: (i, 0)),
            pl.BlockSpec(w1.shape, lambda i: (0, 0)),
            pl.BlockSpec(b1.shape, lambda i: (0, 0)),
            pl.BlockSpec(w2.shape, lambda i: (0, 0)),
            pl.BlockSpec(b2.shape, lambda i: (0, 0)),
        ],
        out_specs=pl.BlockSpec((bt, PADDED_CLASSES), lambda i: (i, 0)),
        compiler_params=pltpu.CompilerParams(
            dimension_semantics=("parallel",),
            vmem_limit_bytes=VMEM_LIMIT_BYTES),
    )(xf, w1, b1, w2, b2)


# ------------------------------- parameters --------------------------------

def init_params(key, fc1_neurons=FC1_NEURONS):
    """PyTorch-default-style uniform(-1/sqrt(fan_in), 1/sqrt(fan_in)) init."""
    ks = jax.random.split(key, 8)

    def u(k, shape, fan_in):
        bound = 1.0 / (fan_in ** 0.5)
        return jax.random.uniform(k, shape, jnp.float32, -bound, bound)

    return {
        "conv1_w": u(ks[0], (10, 1, 5, 5), 1 * 5 * 5),
        "conv1_b": u(ks[1], (10,), 1 * 5 * 5),
        "conv2_w": u(ks[2], (20, 10, 5, 5), 10 * 5 * 5),
        "conv2_b": u(ks[3], (20,), 10 * 5 * 5),
        "fc1_w":   u(ks[4], (fc1_neurons, 320), 320),
        "fc1_b":   u(ks[5], (fc1_neurons,), 320),
        "fc2_w":   u(ks[6], (NUM_CLASSES, fc1_neurons), fc1_neurons),
        "fc2_b":   u(ks[7], (NUM_CLASSES,), fc1_neurons),
    }


def prepare_params(params):
    """One-time repack into kernel-ready layout: conv weights -> (Cout, k*k*Cin)
    bf16 with (kh, kw, ci) column order, biases -> (Cout, 1)/(1, N) f32, fc
    weights pre-transposed to (in, out) bf16, fc2 padded from 47 to 128 output
    lanes (pad bias = -1e9 so padded logits vanish under log_softmax)."""
    def conv_w(w):
        cout, cin, k, _ = w.shape
        return w.transpose(0, 2, 3, 1).reshape(cout, k * k * cin).astype(jnp.bfloat16)

    fc2_w = jnp.pad(params["fc2_w"].T.astype(jnp.float32),
                    ((0, 0), (0, PADDED_CLASSES - NUM_CLASSES)))
    fc2_b = jnp.full((1, PADDED_CLASSES), -1e9, jnp.float32)
    fc2_b = fc2_b.at[0, :NUM_CLASSES].set(params["fc2_b"])

    return {
        "conv1_w": conv_w(params["conv1_w"]),
        "conv1_b": params["conv1_b"].reshape(-1, 1).astype(jnp.float32),
        "conv2_w": conv_w(params["conv2_w"]),
        "conv2_b": params["conv2_b"].reshape(-1, 1).astype(jnp.float32),
        "fc1_w":   params["fc1_w"].T.astype(jnp.bfloat16),          # (320, 64)
        "fc1_b":   params["fc1_b"].reshape(1, -1).astype(jnp.float32),
        "fc2_w":   fc2_w.astype(jnp.bfloat16),                      # (64, 128)
        "fc2_b":   fc2_b,
    }


# --------------------------------- forward ---------------------------------

def cnn_forward(kparams, x):
    """x: (B, 1, 28, 28) f32 NCHW -> (B, 47) log-probabilities."""
    B = x.shape[0]
    pad = (-B) % BATCH_ALIGN                     # static, resolved at trace time
    if pad:
        x = jnp.pad(x, ((0, pad), (0, 0), (0, 0), (0, 0)))
    Bp = B + pad

    # NCHW -> channel-major (Cin=1, B, H, W) bf16 once (size-1 dim move: free).
    x_cm = x.astype(jnp.bfloat16).transpose(1, 0, 2, 3)

    # conv1 -> maxpool(2) -> relu                          (fused kernel #1)
    y, ph, pw = conv_pool_relu(x_cm, kparams["conv1_w"], kparams["conv1_b"], 5,
                               CONV1_TARGET_COLS)
    c1 = kparams["conv1_w"].shape[0]
    x1 = y.reshape(c1, Bp, ph, pw)         # already channel-major: no transpose

    # conv2 -> (Dropout2d: identity in eval) -> maxpool(2) -> relu  (kernel #2)
    y, ph, pw = conv_pool_relu(x1, kparams["conv2_w"], kparams["conv2_b"], 5,
                               CONV2_TARGET_COLS)
    c2 = kparams["conv2_w"].shape[0]

    # flatten exactly like torch .view(-1, 320): per-sample (c, h, w) order
    # (tiny bf16 transpose: Bp*320 elements).
    xf = y.reshape(c2, Bp, ph * pw).transpose(1, 0, 2).reshape(Bp, c2 * ph * pw)

    # fc1 -> relu -> (dropout: identity) -> fc2 -> log_softmax      (kernel #3)
    out = _fc_block(xf, kparams["fc1_w"], kparams["fc1_b"],
                    kparams["fc2_w"], kparams["fc2_b"])
    return out[:B, :NUM_CLASSES]


# ------------------------------ reference (f32) -----------------------------

def reference_forward(params, x):
    def pool_relu(y):
        m = jnp.maximum(jnp.maximum(y[:, :, 0::2, 0::2], y[:, :, 0::2, 1::2]),
                        jnp.maximum(y[:, :, 1::2, 0::2], y[:, :, 1::2, 1::2]))
        return jnp.maximum(m, 0.0)

    def conv(z, w, b):
        out = jax.lax.conv_general_dilated(
            z, w, (1, 1), "VALID", dimension_numbers=("NCHW", "OIHW", "NCHW"))
        return out + b[None, :, None, None]

    y = pool_relu(conv(x, params["conv1_w"], params["conv1_b"]))
    y = pool_relu(conv(y, params["conv2_w"], params["conv2_b"]))
    y = y.reshape(y.shape[0], -1)
    y = jnp.maximum(y @ params["fc1_w"].T + params["fc1_b"], 0.0)
    y = y @ params["fc2_w"].T + params["fc2_b"]
    return jax.nn.log_softmax(y, axis=-1)


if __name__ == "__main__":
    key = jax.random.PRNGKey(0)
    kp, kx = jax.random.split(key)
    params = init_params(kp)
    kparams = prepare_params(params)
    x = jax.random.normal(kx, (2, 1, 28, 28), jnp.float32)

    out = jax.jit(cnn_forward)(kparams, x)
    jax.block_until_ready(out)

    assert out.shape == (2, NUM_CLASSES) and out.dtype == jnp.float32
    # rows of log_softmax exponentiate-sum to 1
    assert jnp.allclose(jnp.sum(jnp.exp(out), axis=-1), 1.0, atol=1e-4)
    # matches the f32 reference network (bf16 MXU operands -> loose tolerance)
    ref = reference_forward(params, x)
    assert jnp.max(jnp.abs(out - ref)) < 0.1
    print("KERNEL_OK")
</pallas_src>

<mosaic_0001>
module attributes {stable_mosaic.version = 11 : i64} {
  func.func @_conv_pool_relu_kernel(%arg0: i32, %arg1: memref<4x25x1152xbf16, #tpu.memory_space<vmem>>, %arg2: memref<10x25xbf16, #tpu.memory_space<vmem>>, %arg3: memref<10x1xf32, #tpu.memory_space<vmem>>, %arg4: memref<10x1152xbf16, #tpu.memory_space<vmem>>) attributes {dimension_semantics = [#tpu.dimension_semantics<parallel>], iteration_bounds = array<i64: 2>, scalar_prefetch = 0 : i64, scratch_operands = 0 : i64, tpu.core_type = #tpu.core_type<tc>, window_params = [{transform_indices = @transform_0, window_bounds = array<i64: 4, 25, 1152>}, {pipeline_mode = #tpu.pipeline_mode<synchronous>, transform_indices = @transform_1, window_bounds = array<i64: 10, 25>}, {pipeline_mode = #tpu.pipeline_mode<synchronous>, transform_indices = @transform_2, window_bounds = array<i64: 10, 1>}, {transform_indices = @transform_3, window_bounds = array<i64: 10, 1152>}]} {
    %c0 = arith.constant 0 : index
    %c0_0 = arith.constant 0 : index
    %0 = vector.load %arg2[%c0, %c0_0] : memref<10x25xbf16, #tpu.memory_space<vmem>>, vector<10x25xbf16>
    %c0_1 = arith.constant 0 : index
    %c0_2 = arith.constant 0 : index
    %c0_3 = arith.constant 0 : index
    %1 = vector.load %arg1[%c0_1, %c0_2, %c0_3] : memref<4x25x1152xbf16, #tpu.memory_space<vmem>>, vector<1x25x1152xbf16>
    %2 = vector.shape_cast %1 : vector<1x25x1152xbf16> to vector<25x1152xbf16>
    %cst = arith.constant dense<0.000000e+00> : vector<10x1152xf32>
    %3 = tpu.matmul %0, %2, %cst {dimension_numbers = #tpu.dot_dimension_numbers<[1], [0], [0], [1], [0, 0, 1, 1], [], []>} : vector<10x25xbf16>, vector<25x1152xbf16>, vector<10x1152xf32> -> vector<10x1152xf32>
    %c1 = arith.constant 1 : index
    %c0_4 = arith.constant 0 : index
    %c0_5 = arith.constant 0 : index
    %4 = vector.load %arg1[%c1, %c0_4, %c0_5] : memref<4x25x1152xbf16, #tpu.memory_space<vmem>>, vector<1x25x1152xbf16>
    %5 = vector.shape_cast %4 : vector<1x25x1152xbf16> to vector<25x1152xbf16>
    %cst_6 = arith.constant dense<0.000000e+00> : vector<10x1152xf32>
    %6 = tpu.matmul %0, %5, %cst_6 {dimension_numbers = #tpu.dot_dimension_numbers<[1], [0], [0], [1], [0, 0, 1, 1], [], []>} : vector<10x25xbf16>, vector<25x1152xbf16>, vector<10x1152xf32> -> vector<10x1152xf32>
    %7 = arith.maximumf %3, %6 : vector<10x1152xf32>
    %c2 = arith.constant 2 : index
    %c0_7 = arith.constant 0 : index
    %c0_8 = arith.constant 0 : index
    %8 = vector.load %arg1[%c2, %c0_7, %c0_8] : memref<4x25x1152xbf16, #tpu.memory_space<vmem>>, vector<1x25x1152xbf16>
    %9 = vector.shape_cast %8 : vector<1x25x1152xbf16> to vector<25x1152xbf16>
    %cst_9 = arith.constant dense<0.000000e+00> : vector<10x1152xf32>
    %10 = tpu.matmul %0, %9, %cst_9 {dimension_numbers = #tpu.dot_dimension_numbers<[1], [0], [0], [1], [0, 0, 1, 1], [], []>} : vector<10x25xbf16>, vector<25x1152xbf16>, vector<10x1152xf32> -> vector<10x1152xf32>
    %11 = arith.maximumf %7, %10 : vector<10x1152xf32>
    %c3 = arith.constant 3 : index
    %c0_10 = arith.constant 0 : index
    %c0_11 = arith.constant 0 : index
    %12 = vector.load %arg1[%c3, %c0_10, %c0_11] : memref<4x25x1152xbf16, #tpu.memory_space<vmem>>, vector<1x25x1152xbf16>
    %13 = vector.shape_cast %12 : vector<1x25x1152xbf16> to vector<25x1152xbf16>
    %cst_12 = arith.constant dense<0.000000e+00> : vector<10x1152xf32>
    %14 = tpu.matmul %0, %13, %cst_12 {dimension_numbers = #tpu.dot_dimension_numbers<[1], [0], [0], [1], [0, 0, 1, 1], [], []>} : vector<10x25xbf16>, vector<25x1152xbf16>, vector<10x1152xf32> -> vector<10x1152xf32>
    %15 = arith.maximumf %11, %14 : vector<10x1152xf32>
    %c0_13 = arith.constant 0 : index
    %c0_14 = arith.constant 0 : index
    %16 = vector.load %arg3[%c0_13, %c0_14] : memref<10x1xf32, #tpu.memory_space<vmem>>, vector<10x1xf32>
    %17 = vector.broadcast %16 : vector<10x1xf32> to vector<10x1152xf32>
    %18 = arith.addf %15, %17 : vector<10x1152xf32>
    %cst_15 = arith.constant 0.000000e+00 : f32
    %19 = vector.broadcast %cst_15 : f32 to vector<10x1152xf32>
    %20 = arith.maximumf %18, %19 : vector<10x1152xf32>
    %21 = arith.truncf %20 : vector<10x1152xf32> to vector<10x1152xbf16>
    %c0_16 = arith.constant 0 : index
    %c0_17 = arith.constant 0 : index
    %22 = vector.load %arg4[%c0_16, %c0_17] : memref<10x1152xbf16, #tpu.memory_space<vmem>>, vector<10x1152xbf16>
    tpu.vector_store %arg4[%c0_16, %c0_17], %21 {strides = array<i32>} : memref<10x1152xbf16, #tpu.memory_space<vmem>>, vector<10x1152xbf16>,
    return
  }
  func.func @transform_0(%arg0: i32) -> (i32, i32, i32) {
    %c0_i32 = arith.constant 0 : i32
    %c0_i32_0 = arith.constant 0 : i32
    %c0_i32_1 = arith.constant 0 : i32
    return %c0_i32, %c0_i32_0, %arg0 : i32, i32, i32
  }
  func.func @transform_1(%arg0: i32) -> (i32, i32) {
    %c0_i32 = arith.constant 0 : i32
    %c0_i32_0 = arith.constant 0 : i32
    %c0_i32_1 = arith.constant 0 : i32
    return %c0_i32, %c0_i32_0 : i32, i32
  }
  func.func @transform_2(%arg0: i32) -> (i32, i32) {
    %c0_i32 = arith.constant 0 : i32
    %c0_i32_0 = arith.constant 0 : i32
    %c0_i32_1 = arith.constant 0 : i32
    return %c0_i32, %c0_i32_0 : i32, i32
  }
  func.func @transform_3(%arg0: i32) -> (i32, i32) {
    %c0_i32 = arith.constant 0 : i32
    %c0_i32_0 = arith.constant 0 : i32
    return %c0_i32, %arg0 : i32, i32
  }
}

module attributes {stable_mosaic.version = 11 : i64} {
  func.func @_conv_pool_relu_kernel(%arg0: i32, %arg1: memref<4x250x128xbf16, #tpu.memory_space<vmem>>, %arg2: memref<20x250xbf16, #tpu.memory_space<vmem>>, %arg3: memref<20x1xf32, #tpu.memory_space<vmem>>, %arg4: memref<20x128xbf16, #tpu.memory_space<vmem>>) attributes {dimension_semantics = [#tpu.dimension_semantics<parallel>], iteration_bounds = array<i64: 2>, scalar_prefetch = 0 : i64, scratch_operands = 0 : i64, tpu.core_type = #tpu.core_type<tc>, window_params = [{transform_indices = @transform_0, window_bounds = array<i64: 4, 250, 128>}, {pipeline_mode = #tpu.pipeline_mode<synchronous>, transform_indices = @transform_1, window_bounds = array<i64: 20, 250>}, {pipeline_mode = #tpu.pipeline_mode<synchronous>, transform_indices = @transform_2, window_bounds = array<i64: 20, 1>}, {transform_indices = @transform_3, window_bounds = array<i64: 20, 128>}]} {
    %c0 = arith.constant 0 : index
    %c0_0 = arith.constant 0 : index
    %0 = vector.load %arg2[%c0, %c0_0] : memref<20x250xbf16, #tpu.memory_space<vmem>>, vector<20x250xbf16>
    %c0_1 = arith.constant 0 : index
    %c0_2 = arith.constant 0 : index
    %c0_3 = arith.constant 0 : index
    %1 = vector.load %arg1[%c0_1, %c0_2, %c0_3] : memref<4x250x128xbf16, #tpu.memory_space<vmem>>, vector<1x250x128xbf16>
    %2 = vector.shape_cast %1 : vector<1x250x128xbf16> to vector<250x128xbf16>
    %cst = arith.constant dense<0.000000e+00> : vector<20x128xf32>
    %3 = tpu.matmul %0, %2, %cst {dimension_numbers = #tpu.dot_dimension_numbers<[1], [0], [0], [1], [0, 0, 1, 1], [], []>} : vector<20x250xbf16>, vector<250x128xbf16>, vector<20x128xf32> -> vector<20x128xf32>
    %c1 = arith.constant 1 : index
    %c0_4 = arith.constant 0 : index
    %c0_5 = arith.constant 0 : index
    %4 = vector.load %arg1[%c1, %c0_4, %c0_5] : memref<4x250x128xbf16, #tpu.memory_space<vmem>>, vector<1x250x128xbf16>
    %5 = vector.shape_cast %4 : vector<1x250x128xbf16> to vector<250x128xbf16>
    %cst_6 = arith.constant dense<0.000000e+00> : vector<20x128xf32>
    %6 = tpu.matmul %0, %5, %cst_6 {dimension_numbers = #tpu.dot_dimension_numbers<[1], [0], [0], [1], [0, 0, 1, 1], [], []>} : vector<20x250xbf16>, vector<250x128xbf16>, vector<20x128xf32> -> vector<20x128xf32>
    %7 = arith.maximumf %3, %6 : vector<20x128xf32>
    %c2 = arith.constant 2 : index
    %c0_7 = arith.constant 0 : index
    %c0_8 = arith.constant 0 : index
    %8 = vector.load %arg1[%c2, %c0_7, %c0_8] : memref<4x250x128xbf16, #tpu.memory_space<vmem>>, vector<1x250x128xbf16>
    %9 = vector.shape_cast %8 : vector<1x250x128xbf16> to vector<250x128xbf16>
    %cst_9 = arith.constant dense<0.000000e+00> : vector<20x128xf32>
    %10 = tpu.matmul %0, %9, %cst_9 {dimension_numbers = #tpu.dot_dimension_numbers<[1], [0], [0], [1], [0, 0, 1, 1], [], []>} : vector<20x250xbf16>, vector<250x128xbf16>, vector<20x128xf32> -> vector<20x128xf32>
    %11 = arith.maximumf %7, %10 : vector<20x128xf32>
    %c3 = arith.constant 3 : index
    %c0_10 = arith.constant 0 : index
    %c0_11 = arith.constant 0 : index
    %12 = vector.load %arg1[%c3, %c0_10, %c0_11] : memref<4x250x128xbf16, #tpu.memory_space<vmem>>, vector<1x250x128xbf16>
    %13 = vector.shape_cast %12 : vector<1x250x128xbf16> to vector<250x128xbf16>
    %cst_12 = arith.constant dense<0.000000e+00> : vector<20x128xf32>
    %14 = tpu.matmul %0, %13, %cst_12 {dimension_numbers = #tpu.dot_dimension_numbers<[1], [0], [0], [1], [0, 0, 1, 1], [], []>} : vector<20x250xbf16>, vector<250x128xbf16>, vector<20x128xf32> -> vector<20x128xf32>
    %15 = arith.maximumf %11, %14 : vector<20x128xf32>
    %c0_13 = arith.constant 0 : index
    %c0_14 = arith.constant 0 : index
    %16 = vector.load %arg3[%c0_13, %c0_14] : memref<20x1xf32, #tpu.memory_space<vmem>>, vector<20x1xf32>
    %17 = vector.broadcast %16 : vector<20x1xf32> to vector<20x128xf32>
    %18 = arith.addf %15, %17 : vector<20x128xf32>
    %cst_15 = arith.constant 0.000000e+00 : f32
    %19 = vector.broadcast %cst_15 : f32 to vector<20x128xf32>
    %20 = arith.maximumf %18, %19 : vector<20x128xf32>
    %21 = arith.truncf %20 : vector<20x128xf32> to vector<20x128xbf16>
    %c0_16 = arith.constant 0 : index
    %c0_17 = arith.constant 0 : index
    %22 = vector.load %arg4[%c0_16, %c0_17] : memref<20x128xbf16, #tpu.memory_space<vmem>>, vector<20x128xbf16>
    tpu.vector_store %arg4[%c0_16, %c0_17], %21 {strides = array<i32>} : memref<20x128xbf16, #tpu.memory_space<vmem>>, vector<20x128xbf16>,
    return
  }
  func.func @transform_0(%arg0: i32) -> (i32, i32, i32) {
    %c0_i32 = arith.constant 0 : i32
    %c0_i32_0 = arith.constant 0 : i32
    %c0_i32_1 = arith.constant 0 : i32
    return %c0_i32, %c0_i32_0, %arg0 : i32, i32, i32
  }
  func.func @transform_1(%arg0: i32) -> (i32, i32) {
    %c0_i32 = arith.constant 0 : i32
    %c0_i32_0 = arith.constant 0 : i32
    %c0_i32_1 = arith.constant 0 : i32
    return %c0_i32, %c0_i32_0 : i32, i32
  }
  func.func @transform_2(%arg0: i32) -> (i32, i32) {
    %c0_i32 = arith.constant 0 : i32
    %c0_i32_0 = arith.constant 0 : i32
    %c0_i32_1 = arith.constant 0 : i32
    return %c0_i32, %c0_i32_0 : i32, i32
  }
  func.func @transform_3(%arg0: i32) -> (i32, i32) {
    %c0_i32 = arith.constant 0 : i32
    %c0_i32_0 = arith.constant 0 : i32
    return %c0_i32, %arg0 : i32, i32
  }
}

module attributes {stable_mosaic.version = 11 : i64} {
  func.func @_fc_fused_kernel(%arg0: i32, %arg1: memref<16x320xbf16, #tpu.memory_space<vmem>>, %arg2: memref<320x64xbf16, #tpu.memory_space<vmem>>, %arg3: memref<1x64xf32, #tpu.memory_space<vmem>>, %arg4: memref<64x128xbf16, #tpu.memory_space<vmem>>, %arg5: memref<1x128xf32, #tpu.memory_space<vmem>>, %arg6: memref<16x128xf32, #tpu.memory_space<vmem>>) attributes {dimension_semantics = [#tpu.dimension_semantics<parallel>], iteration_bounds = array<i64: 1>, scalar_prefetch = 0 : i64, scratch_operands = 0 : i64, tpu.core_type = #tpu.core_type<tc>, window_params = [{transform_indices = @transform_0, window_bounds = array<i64: 16, 320>}, {pipeline_mode = #tpu.pipeline_mode<synchronous>, transform_indices = @transform_1, window_bounds = array<i64: 320, 64>}, {pipeline_mode = #tpu.pipeline_mode<synchronous>, transform_indices = @transform_2, window_bounds = array<i64: 1, 64>}, {pipeline_mode = #tpu.pipeline_mode<synchronous>, transform_indices = @transform_3, window_bounds = array<i64: 64, 128>}, {pipeline_mode = #tpu.pipeline_mode<synchronous>, transform_indices = @transform_4, window_bounds = array<i64: 1, 128>}, {transform_indices = @transform_5, window_bounds = array<i64: 16, 128>}]} {
    %c0 = arith.constant 0 : index
    %c0_0 = arith.constant 0 : index
    %0 = vector.load %arg1[%c0, %c0_0] : memref<16x320xbf16, #tpu.memory_space<vmem>>, vector<16x320xbf16>
    %c0_1 = arith.constant 0 : index
    %c0_2 = arith.constant 0 : index
    %1 = vector.load %arg2[%c0_1, %c0_2] : memref<320x64xbf16, #tpu.memory_space<vmem>>, vector<320x64xbf16>
    %cst = arith.constant dense<0.000000e+00> : vector<16x64xf32>
    %2 = tpu.matmul %0, %1, %cst {dimension_numbers = #tpu.dot_dimension_numbers<[1], [0], [0], [1], [0, 0, 1, 1], [], []>} : vector<16x320xbf16>, vector<320x64xbf16>, vector<16x64xf32> -> vector<16x64xf32>
    %c0_3 = arith.constant 0 : index
    %c0_4 = arith.constant 0 : index
    %3 = vector.load %arg3[%c0_3, %c0_4] : memref<1x64xf32, #tpu.memory_space<vmem>>, vector<1x64xf32>
    %4 = vector.broadcast %3 : vector<1x64xf32> to vector<16x64xf32>
    %5 = arith.addf %2, %4 : vector<16x64xf32>
    %cst_5 = arith.constant 0.000000e+00 : f32
    %6 = vector.broadcast %cst_5 : f32 to vector<16x64xf32>
    %7 = arith.maximumf %5, %6 : vector<16x64xf32>
    %8 = arith.truncf %7 : vector<16x64xf32> to vector<16x64xbf16>
    %c0_6 = arith.constant 0 : index
    %c0_7 = arith.constant 0 : index
    %9 = vector.load %arg4[%c0_6, %c0_7] : memref<64x128xbf16, #tpu.memory_space<vmem>>, vector<64x128xbf16>
    %cst_8 = arith.constant dense<0.000000e+00> : vector<16x128xf32>
    %10 = tpu.matmul %8, %9, %cst_8 {dimension_numbers = #tpu.dot_dimension_numbers<[1], [0], [0], [1], [0, 0, 1, 1], [], []>} : vector<16x64xbf16>, vector<64x128xbf16>, vector<16x128xf32> -> vector<16x128xf32>
    %c0_9 = arith.constant 0 : index
    %c0_10 = arith.constant 0 : index
    %11 = vector.load %arg5[%c0_9, %c0_10] : memref<1x128xf32, #tpu.memory_space<vmem>>, vector<1x128xf32>
    %12 = vector.broadcast %11 : vector<1x128xf32> to vector<16x128xf32>
    %13 = arith.addf %10, %12 : vector<16x128xf32>
    %cst_11 = arith.constant dense<0xFF800000> : vector<16xf32>
    %14 = vector.multi_reduction <maximumf>, %13, %cst_11 [1] : vector<16x128xf32> to vector<16xf32>
    %15 = vector.shape_cast %14 : vector<16xf32> to vector<16x1xf32>
    %16 = vector.broadcast %15 : vector<16x1xf32> to vector<16x128xf32>
    %17 = arith.subf %13, %16 : vector<16x128xf32>
    %18 = math.exp %17 : vector<16x128xf32>
    %cst_12 = arith.constant dense<0.000000e+00> : vector<16xf32>
    %19 = vector.multi_reduction <add>, %18, %cst_12 [1] : vector<16x128xf32> to vector<16xf32>
    %20 = vector.shape_cast %19 : vector<16xf32> to vector<16x1xf32>
    %21 = vector.broadcast %15 : vector<16x1xf32> to vector<16x128xf32>
    %22 = arith.subf %13, %21 : vector<16x128xf32>
    %23 = math.log %20 : vector<16x1xf32>
    %24 = vector.broadcast %23 : vector<16x1xf32> to vector<16x128xf32>
    %25 = arith.subf %22, %24 : vector<16x128xf32>
    %c0_13 = arith.constant 0 : index
    %c0_14 = arith.constant 0 : index
    %26 = vector.load %arg6[%c0_13, %c0_14] : memref<16x128xf32, #tpu.memory_space<vmem>>, vector<16x128xf32>
    tpu.vector_store %arg6[%c0_13, %c0_14], %25 {strides = array<i32>} : memref<16x128xf32, #tpu.memory_space<vmem>>, vector<16x128xf32>,
    return
  }
  func.func @transform_0(%arg0: i32) -> (i32, i32) {
    %c0_i32 = arith.constant 0 : i32
    %c0_i32_0 = arith.constant 0 : i32
    return %arg0, %c0_i32 : i32, i32
  }
  func.func @transform_1(%arg0: i32) -> (i32, i32) {
    %c0_i32 = arith.constant 0 : i32
    %c0_i32_0 = arith.constant 0 : i32
    %c0_i32_1 = arith.constant 0 : i32
    return %c0_i32, %c0_i32_0 : i32, i32
  }
  func.func @transform_2(%arg0: i32) -> (i32, i32) {
    %c0_i32 = arith.constant 0 : i32
    %c0_i32_0 = arith.constant 0 : i32
    %c0_i32_1 = arith.constant 0 : i32
    return %c0_i32, %c0_i32_0 : i32, i32
  }
  func.func @transform_3(%arg0: i32) -> (i32, i32) {
    %c0_i32 = arith.constant 0 : i32
    %c0_i32_0 = arith.constant 0 : i32
    %c0_i32_1 = arith.constant 0 : i32
    return %c0_i32, %c0_i32_0 : i32, i32
  }
  func.func @transform_4(%arg0: i32) -> (i32, i32) {
    %c0_i32 = arith.constant 0 : i32
    %c0_i32_0 = arith.constant 0 : i32
    %c0_i32_1 = arith.constant 0 : i32
    return %c0_i32, %c0_i32_0 : i32, i32
  }
  func.func @transform_5(%arg0: i32) -> (i32, i32) {
    %c0_i32 = arith.constant 0 : i32
    %c0_i32_0 = arith.constant 0 : i32
    return %arg0, %c0_i32 : i32, i32
  }
}

</mosaic_0001>

<bundles_post_ra>
// kernel: cnn_forward.3
= control target key start
LH: loop header
LB: loop body
LE: loop exit
PB: predicated region body
PF: predicated region fallthrough
CT: control target
= control target key end

     0   :  { %s2480_s12 = smov 0   ;;  %s2482_s13 = smov 0   ;;  %s3050_s0 = inlined_call_operand.vmem [shape: bf16[4,25,2304], index: 0, kind: input, shape index: {}]   ;;  %s3051_s1 = inlined_call_operand.vmem [shape: bf16[10,25], index: 1, kind: input, shape index: {}]   ;;  %s3052_s2 = inlined_call_operand.vmem [shape: f32[10,1], index: 2, kind: input, shape index: {}]   ;;  %s3053_s3 = inlined_call_operand.vmem [shape: bf16[10,2304], index: 3, kind: output, shape index: {}]  }
   0x1   :  { %s2484_s14 = smov 0  }
   0x2 LB: > { %s2031_s15 = sadd.s32 4294967295, %s2454_s14   ;;  %s2497_s16 = sadd.s32 1, %s2454_s14   ;;  %s2454_s14 = sphi %s2484_s14, %s3057_s14   ;;  %s2450_s13 = sphi %s2482_s13, %s3056_s13   ;;  %s2446_s12 = sphi %s2480_s12, %s3055_s12  }
   0x3   : > { %s17_s17 = ssub.s32 %s2454_s14, %s2497_s16  ;;  %s20_s18 = sadd.s32 1, %s2450_s13 }
   0x4   : > { %p18_p0 = scmp.eq.s32.totalorder %s17_s17, 0  ;;  %p27_p1 = scmp.ne.s32.totalorder %s2450_s13, %s2446_s12 }
   0x5   : > { %p28_p2 = scmp.eq.s32.totalorder %s2454_s14, 0  ;;  %p99_p3 = scmp.eq.s32.totalorder %s2031_s15, 1 }
   0x6   : > { %s2508_s19 = scalar_select %p18_p0, %s2450_s13, %s20_s18  }
   0x7   : > { %p29_p4 = por %p28_p2, %p27_p1  ;;  %p2510_p5 = por %p99_p3, %p27_p1 }
   0x8   : > { %p2034_p6 = scmp.ge.s32.totalorder %s2454_s14, 2 }
   0xa   : > { %127 = sbr.rel (%p2034_p6) target bundleno = 64 (0x40), region = 24 }
  0x11   : > { %130 = sbr.rel (!%p29_p4) target bundleno = 64 (0x40), region = 28  ;;  %s132_s21 = sand.u32 (%p29_p4), 1, %s2450_s13  }
  0x12   : > { %s2239_s22 = smul.u32 (%p29_p4), 36, %s2454_s14 }
  0x13   : > { %s2295_s23 = smul.u32 (%p29_p4), 576, %s132_s21 }
  0x14   : > { %s2520_s26 = scalar_lea.vmem (%p29_p4), %s3050_s0, %s2239_s22 }
  0x15   : > { %v152_v0 = vld [vmem:[%s2520_s26] sm:$0xff] (%p29_p4)  ;;  %v154_v1 = vld [vmem:[%s2520_s26 + $0x8] sm:$0xff] (%p29_p4)  ;;  %v156_v2 = vld [vmem:[%s2520_s26 + $0x10] sm:$0xff] (%p29_p4)  ;;  %s2525_s27 = scalar_lea.vmem (%p29_p4), [#allocation2], %s2295_s23 }
  0x16   : > { %153 = vst [vmem:[%s2525_s27] sm:$0xff] (%p29_p4), %v152_v0  ;;  %155 = vst [vmem:[%s2525_s27 + $0x8] sm:$0xff] (%p29_p4), %v154_v1  ;;  %v158_v3 = vld [vmem:[%s2520_s26 + $0x18] sm:$0xff] (%p29_p4)  ;;  %v160_v4 = vld [vmem:[%s2520_s26 + $0x48] sm:$0xff] (%p29_p4) }
  0x17   : > { %157 = vst [vmem:[%s2525_s27 + $0x10] sm:$0xff] (%p29_p4), %v156_v2  ;;  %v162_v5 = vld [vmem:[%s2520_s26 + $0x50] sm:$0xff] (%p29_p4)  ;;  %159 = vst [vmem:[%s2525_s27 + $0x18] sm:$0xff] (%p29_p4), %v158_v3  ;;  %v164_v6 = vld [vmem:[%s2520_s26 + $0x58] sm:$0xff] (%p29_p4) }
  0x18   : > { %161 = vst [vmem:[%s2525_s27 + $0x24] sm:$0xff] %v160_v4  ;;  %163 = vst [vmem:[%s2525_s27 + $0x2c] sm:$0xff] %v162_v5  ;;  %v166_v7 = vld [vmem:[%s2520_s26 + $0x60] sm:$0xff]  ;;  %v168_v8 = vld [vmem:[%s2520_s26 + $0x90] sm:$0xff] }
  0x19   : > { %165 = vst [vmem:[%s2525_s27 + $0x34] sm:$0xff] %v164_v6  ;;  %167 = vst [vmem:[%s2525_s27 + $0x3c] sm:$0xff] %v166_v7  ;;  %v170_v9 = vld [vmem:[%s2520_s26 + $0x98] sm:$0xff]  ;;  %v172_v10 = vld [vmem:[%s2520_s26 + $0xa0] sm:$0xff] }
  0x1a   : > { %169 = vst [vmem:[%s2525_s27 + $0x48] sm:$0xff] %v168_v8  ;;  %v174_v11 = vld [vmem:[%s2520_s26 + $0xa8] sm:$0xff]  ;;  %171 = vst [vmem:[%s2525_s27 + $0x50] sm:$0xff] %v170_v9  ;;  %v176_v12 = vld [vmem:[%s2520_s26 + $0xd8] sm:$0xff] }
  0x1b   : > { %173 = vst [vmem:[%s2525_s27 + $0x58] sm:$0xff] %v172_v10  ;;  %175 = vst [vmem:[%s2525_s27 + $0x60] sm:$0xff] %v174_v11  ;;  %v178_v13 = vld [vmem:[%s2520_s26 + $0xe0] sm:$0xff]  ;;  %v180_v14 = vld [vmem:[%s2520_s26 + $0xe8] sm:$0xff] }
  0x1c   : > { %177 = vst [vmem:[%s2525_s27 + $0x6c] sm:$0xff] %v176_v12  ;;  %179 = vst [vmem:[%s2525_s27 + $0x74] sm:$0xff] %v178_v13  ;;  %v182_v15 = vld [vmem:[%s2520_s26 + $0xf0] sm:$0xff]  ;;  %v184_v16 = vld [vmem:[%s2520_s26 + $0x120] sm:$0xff] }
  0x1d   : > { %181 = vst [vmem:[%s2525_s27 + $0x7c] sm:$0xff] %v180_v14  ;;  %v186_v17 = vld [vmem:[%s2520_s26 + $0x128] sm:$0xff]  ;;  %183 = vst [vmem:[%s2525_s27 + $0x84] sm:$0xff] %v182_v15  ;;  %v188_v18 = vld [vmem:[%s2520_s26 + $0x130] sm:$0xff] }
  0x1e   : > { %185 = vst [vmem:[%s2525_s27 + $0x90] sm:$0xff] %v184_v16  ;;  %187 = vst [vmem:[%s2525_s27 + $0x98] sm:$0xff] %v186_v17  ;;  %v190_v19 = vld [vmem:[%s2520_s26 + $0x138] sm:$0xff]  ;;  %v192_v20 = vld [vmem:[%s2520_s26 + $0x168] sm:$0xff] }
  0x1f   : > { %189 = vst [vmem:[%s2525_s27 + $0xa0] sm:$0xff] %v188_v18  ;;  %191 = vst [vmem:[%s2525_s27 + $0xa8] sm:$0xff] %v190_v19  ;;  %v194_v21 = vld [vmem:[%s2520_s26 + $0x170] sm:$0xff]  ;;  %v196_v22 = vld [vmem:[%s2520_s26 + $0x178] sm:$0xff] }
  0x20   : > { %193 = vst [vmem:[%s2525_s27 + $0xb4] sm:$0xff] %v192_v20  ;;  %v198_v23 = vld [vmem:[%s2520_s26 + $0x180] sm:$0xff]  ;;  %195 = vst [vmem:[%s2525_s27 + $0xbc] sm:$0xff] %v194_v21  ;;  %v200_v24 = vld [vmem:[%s2520_s26 + $0x1b0] sm:$0xff] }
  0x21   : > { %197 = vst [vmem:[%s2525_s27 + $0xc4] sm:$0xff] %v196_v22  ;;  %199 = vst [vmem:[%s2525_s27 + $0xcc] sm:$0xff] %v198_v23  ;;  %v202_v25 = vld [vmem:[%s2520_s26 + $0x1b8] sm:$0xff]  ;;  %v204_v26 = vld [vmem:[%s2520_s26 + $0x1c0] sm:$0xff] }
  0x22   : > { %201 = vst [vmem:[%s2525_s27 + $0xd8] sm:$0xff] %v200_v24  ;;  %203 = vst [vmem:[%s2525_s27 + $0xe0] sm:$0xff] %v202_v25  ;;  %v206_v27 = vld [vmem:[%s2520_s26 + $0x1c8] sm:$0xff]  ;;  %v208_v28 = vld [vmem:[%s2520_s26 + $0x1f8] sm:$0xff] }
  0x23   : > { %205 = vst [vmem:[%s2525_s27 + $0xe8] sm:$0xff] %v204_v26  ;;  %v210_v29 = vld [vmem:[%s2520_s26 + $0x200] sm:$0xff]  ;;  %207 = vst [vmem:[%s2525_s27 + $0xf0] sm:$0xff] %v206_v27  ;;  %v212_v30 = vld [vmem:[%s2520_s26 + $0x208] sm:$0xff] }
  0x24   : > { %209 = vst [vmem:[%s2525_s27 + $0xfc] sm:$0xff] %v208_v28  ;;  %211 = vst [vmem:[%s2525_s27 + $0x104] sm:$0xff] %v210_v29  ;;  %v214_v31 = vld [vmem:[%s2520_s26 + $0x210] sm:$0xff]  ;;  %v216_v32 = vld [vmem:[%s2520_s26 + $0x240] sm:$0xff] }
  0x25   : > { %213 = vst [vmem:[%s2525_s27 + $0x10c] sm:$0xff] %v212_v30  ;;  %215 = vst [vmem:[%s2525_s27 + $0x114] sm:$0xff] %v214_v31  ;;  %v218_v33 = vld [vmem:[%s2520_s26 + $0x248] sm:$0xff]  ;;  %v220_v34 = vld [vmem:[%s2520_s26 + $0x250] sm:$0xff] }
  0x26   : > { %217 = vst [vmem:[%s2525_s27 + $0x120] sm:$0xff] %v216_v32  ;;  %v222_v35 = vld [vmem:[%s2520_s26 + $0x258] sm:$0xff]  ;;  %219 = vst [vmem:[%s2525_s27 + $0x128] sm:$0xff] %v218_v33  ;;  %v224_v36 = vld [vmem:[%s2520_s26 + $0x288] sm:$0xff] }
  0x27   : > { %221 = vst [vmem:[%s2525_s27 + $0x130] sm:$0xff] %v220_v34  ;;  %223 = vst [vmem:[%s2525_s27 + $0x138] sm:$0xff] %v222_v35  ;;  %v226_v37 = vld [vmem:[%s2520_s26 + $0x290] sm:$0xff]  ;;  %v228_v38 = vld [vmem:[%s2520_s26 + $0x298] sm:$0xff] }
  0x28   : > { %225 = vst [vmem:[%s2525_s27 + $0x144] sm:$0xff] %v224_v36  ;;  %227 = vst [vmem:[%s2525_s27 + $0x14c] sm:$0xff] %v226_v37  ;;  %v230_v39 = vld [vmem:[%s2520_s26 + $0x2a0] sm:$0xff]  ;;  %v232_v40 = vld [vmem:[%s2520_s26 + $0x2d0] sm:$0xff] }
  0x29   : > { %229 = vst [vmem:[%s2525_s27 + $0x154] sm:$0xff] %v228_v38  ;;  %v234_v41 = vld [vmem:[%s2520_s26 + $0x2d8] sm:$0xff]  ;;  %231 = vst [vmem:[%s2525_s27 + $0x15c] sm:$0xff] %v230_v39  ;;  %v236_v42 = vld [vmem:[%s2520_s26 + $0x2e0] sm:$0xff] }
  0x2a   : > { %233 = vst [vmem:[%s2525_s27 + $0x168] sm:$0xff] %v232_v40  ;;  %235 = vst [vmem:[%s2525_s27 + $0x170] sm:$0xff] %v234_v41  ;;  %v238_v43 = vld [vmem:[%s2520_s26 + $0x2e8] sm:$0xff]  ;;  %v240_v44 = vld [vmem:[%s2520_s26 + $0x318] sm:$0xff] }
  0x2b   : > { %237 = vst [vmem:[%s2525_s27 + $0x178] sm:$0xff] %v236_v42  ;;  %239 = vst [vmem:[%s2525_s27 + $0x180] sm:$0xff] %v238_v43  ;;  %v242_v45 = vld [vmem:[%s2520_s26 + $0x320] sm:$0xff]  ;;  %v244_v46 = vld [vmem:[%s2520_s26 + $0x328] sm:$0xff] }
  0x2c   : > { %241 = vst [vmem:[%s2525_s27 + $0x18c] sm:$0xff] %v240_v44  ;;  %v246_v47 = vld [vmem:[%s2520_s26 + $0x330] sm:$0xff]  ;;  %243 = vst [vmem:[%s2525_s27 + $0x194] sm:$0xff] %v242_v45  ;;  %v248_v48 = vld [vmem:[%s2520_s26 + $0x360] sm:$0xff] }
  0x2d   : > { %245 = vst [vmem:[%s2525_s27 + $0x19c] sm:$0xff] %v244_v46  ;;  %247 = vst [vmem:[%s2525_s27 + $0x1a4] sm:$0xff] %v246_v47  ;;  %v250_v49 = vld [vmem:[%s2520_s26 + $0x368] sm:$0xff]  ;;  %v252_v50 = vld [vmem:[%s2520_s26 + $0x370] sm:$0xff] }
  0x2e   : > { %249 = vst [vmem:[%s2525_s27 + $0x1b0] sm:$0xff] %v248_v48  ;;  %251 = vst [vmem:[%s2525_s27 + $0x1b8] sm:$0xff] %v250_v49  ;;  %v254_v51 = vld [vmem:[%s2520_s26 + $0x378] sm:$0xff]  ;;  %v256_v52 = vld [vmem:[%s2520_s26 + $0x3a8] sm:$0xff] }
  0x2f   : > { %253 = vst [vmem:[%s2525_s27 + $0x1c0] sm:$0xff] %v252_v50  ;;  %v258_v53 = vld [vmem:[%s2520_s26 + $0x3b0] sm:$0xff]  ;;  %255 = vst [vmem:[%s2525_s27 + $0x1c8] sm:$0xff] %v254_v51  ;;  %v260_v54 = vld [vmem:[%s2520_s26 + $0x3b8] sm:$0xff] }
  0x30   : > { %257 = vst [vmem:[%s2525_s27 + $0x1d4] sm:$0xff] %v256_v52  ;;  %259 = vst [vmem:[%s2525_s27 + $0x1dc] sm:$0xff] %v258_v53  ;;  %v262_v55 = vld [vmem:[%s2520_s26 + $0x3c0] sm:$0xff]  ;;  %v264_v56 = vld [vmem:[%s2520_s26 + $0x3f0] sm:$0xff] }
  0x31   : > { %261 = vst [vmem:[%s2525_s27 + $0x1e4] sm:$0xff] %v260_v54  ;;  %263 = vst [vmem:[%s2525_s27 + $0x1ec] sm:$0xff] %v262_v55  ;;  %v266_v57 = vld [vmem:[%s2520_s26 + $0x3f8] sm:$0xff]  ;;  %v268_v58 = vld [vmem:[%s2520_s26 + $0x400] sm:$0xff] }
  0x32   : > { %265 = vst [vmem:[%s2525_s27 + $0x1f8] sm:$0xff] %v264_v56  ;;  %v270_v59 = vld [vmem:[%s2520_s26 + $0x408] sm:$0xff]  ;;  %267 = vst [vmem:[%s2525_s27 + $0x200] sm:$0xff] %v266_v57  ;;  %v272_v60 = vld [vmem:[%s2520_s26 + $0x438] sm:$0xff] }
  0x33   : > { %269 = vst [vmem:[%s2525_s27 + $0x208] sm:$0xff] %v268_v58  ;;  %271 = vst [vmem:[%s2525_s27 + $0x210] sm:$0xff] %v270_v59  ;;  %v274_v61 = vld [vmem:[%s2520_s26 + $0x440] sm:$0xff]  ;;  %v276_v62 = vld [vmem:[%s2520_s26 + $0x448] sm:$0xff] }
  0x34   : > { %273 = vst [vmem:[%s2525_s27 + $0x21c] sm:$0xff] %v272_v60  ;;  %275 = vst [vmem:[%s2525_s27 + $0x224] sm:$0xff] %v274_v61  ;;  %v278_v63 = vld [vmem:[%s2520_s26 + $0x450] sm:$0xff]  ;;  %v2036_v0 = vld [vmem:[%s2520_s26 + $0x20] sm:$0xf] }
  0x35   : > { %277 = vst [vmem:[%s2525_s27 + $0x22c] sm:$0xff] %v276_v62  ;;  %v2038_v1 = vld [vmem:[%s2520_s26 + $0x68] sm:$0xf]  ;;  %279 = vst [vmem:[%s2525_s27 + $0x234] sm:$0xff] %v278_v63  ;;  %v2040_v2 = vld [vmem:[%s2520_s26 + $0xb0] sm:$0xf] }
  0x36   : > { %2037 = vst [vmem:[%s2525_s27 + $0x20] sm:$0xf] %v2036_v0  ;;  %2039 = vst [vmem:[%s2525_s27 + $0x44] sm:$0xf] %v2038_v1  ;;  %v2042_v3 = vld [vmem:[%s2520_s26 + $0xf8] sm:$0xf] }
  0x37   : > { %v2044_v4 = vld [vmem:[%s2520_s26 + $0x140] sm:$0xf]  ;;  %2041 = vst [vmem:[%s2525_s27 + $0x68] sm:$0xf] %v2040_v2  ;;  %2043 = vst [vmem:[%s2525_s27 + $0x8c] sm:$0xf] %v2042_v3 }
  0x38   : > { %2045 = vst [vmem:[%s2525_s27 + $0xb0] sm:$0xf] %v2044_v4  ;;  %v2046_v5 = vld [vmem:[%s2520_s26 + $0x188] sm:$0xf]  ;;  %v2048_v6 = vld [vmem:[%s2520_s26 + $0x1d0] sm:$0xf] }
  0x39   : > { %v2050_v7 = vld [vmem:[%s2520_s26 + $0x218] sm:$0xf]  ;;  %2047 = vst [vmem:[%s2525_s27 + $0xd4] sm:$0xf] %v2046_v5  ;;  %2049 = vst [vmem:[%s2525_s27 + $0xf8] sm:$0xf] %v2048_v6 }
  0x3a   : > { %2051 = vst [vmem:[%s2525_s27 + $0x11c] sm:$0xf] %v2050_v7  ;;  %v2052_v8 = vld [vmem:[%s2520_s26 + $0x260] sm:$0xf]  ;;  %v2054_v9 = vld [vmem:[%s2520_s26 + $0x2a8] sm:$0xf] }
  0x3b   : > { %v2056_v10 = vld [vmem:[%s2520_s26 + $0x2f0] sm:$0xf]  ;;  %2053 = vst [vmem:[%s2525_s27 + $0x140] sm:$0xf] %v2052_v8  ;;  %2055 = vst [vmem:[%s2525_s27 + $0x164] sm:$0xf] %v2054_v9 }
  0x3c   : > { %2057 = vst [vmem:[%s2525_s27 + $0x188] sm:$0xf] %v2056_v10  ;;  %v2058_v11 = vld [vmem:[%s2520_s26 + $0x338] sm:$0xf]  ;;  %v2060_v12 = vld [vmem:[%s2520_s26 + $0x380] sm:$0xf] }
  0x3d   : > { %v2062_v13 = vld [vmem:[%s2520_s26 + $0x3c8] sm:$0xf]  ;;  %2059 = vst [vmem:[%s2525_s27 + $0x1ac] sm:$0xf] %v2058_v11  ;;  %2061 = vst [vmem:[%s2525_s27 + $0x1d0] sm:$0xf] %v2060_v12 }
  0x3e   : > { %2063 = vst [vmem:[%s2525_s27 + $0x1f4] sm:$0xf] %v2062_v13  ;;  %v2064_v14 = vld [vmem:[%s2520_s26 + $0x410] sm:$0xf]  ;;  %v2066_v15 = vld [vmem:[%s2520_s26 + $0x458] sm:$0xf] }
  0x3f   : > { %2065 = vst [vmem:[%s2525_s27 + $0x218] sm:$0xf] %v2064_v14  ;;  %2067 = vst [vmem:[%s2525_s27 + $0x23c] sm:$0xf] %v2066_v15 }
  0x40 PF: > { %p2068_p7 = scmp.ge.s32.totalorder %s2454_s14, 1  ;;  %p323_p8 = scmp.lt.s32.totalorder %s2454_s14, 3 }
  0x42   : > { %p324_p9 = pnand %p2068_p7, %p323_p8 }
  0x43   : > { %s330_s28 = sand.u32 (!%p324_p9), 1, %s2446_s12   ;;  %vm469_vm0 = vcmask (!%p324_p9), 1043456   ;;  %v1799_v16 = vld [vmem:[%s3052_s2] sm:$0xff] (!%p324_p9)  ;;  %v2456_v17 = vmov (!%p324_p9), 0   ;;  %vm470_vm1 = vcmask (!%p324_p9), 1044480   ;;  %v2457_v18 = vmov (!%p324_p9), 65535  }
  0x44   : > { %327 = sbr.rel (%p324_p9) target bundleno = 385 (0x181), region = 54  ;;  %532 = vmatprep.mubr.bf16.mxu0 (!%p324_p9), %v2456_v17  ;;  %575 = vmatprep.mubr.bf16.mxu1 (!%p324_p9), %v2456_v17  ;;  %v471_v19 = vsel (!%p324_p9), %vm469_vm0, 4294967295, %v2457_v18  ;;  %v1800_v20 = vld [vmem:[%s3052_s2 + $0x8] sm:$0x3] (!%p324_p9)  ;;  %v2715_v32 = vld [vmem:[%s3051_s1] sm:$0x1f] (!%p324_p9)  }
  0x45   : > { %s2296_s4 = smul.u32 (!%p324_p9), 576, %s330_s28  ;;  %2326 = vset.pattern.permute.xlu0 (!%p324_p9), %v2456_v17  ;;  %v2704_v25 = vsel (!%p324_p9), %vm470_vm1, %v471_v19, 0  ;;  %vm465_vm2 = vcmask (!%p324_p9), 203776   ;;  %v2458_v53 = vmov (!%p324_p9), 0.0   ;;  %vm2459_vm3 = vmmov (!%p324_p9), 0  }
  0x46   : > { %1803 = vperm.xlu0 (!%p324_p9), %2326, %v1799_v16   ;;  %s2297_s10 = smul.u32 (!%p324_p9), 72, %s330_s28 }
  0x47   : > { %s2698_s7 = scalar_lea.vmem (!%p324_p9), [#allocation2], %s2296_s4 }
  0x48   : > { %v2327_v21 = vld [vmem:[%s2698_s7 + $0x4] ss:$36 sps:$4 sm:$0xff] (!%p324_p9)   ;;  %v2329_v22 = vld [vmem:[%s2698_s7 + $0xc] ss:$36 sps:$4 sm:$0xff] (!%p324_p9)   ;;  %v2342_v33 = vld [vmem:[%s2698_s7 + $0x14] ss:$36 sps:$4 sm:$0xff] (!%p324_p9)  }
  0x49   : > { %500 = vmatprep.subr.bf16.mxu0 (!%p324_p9), %v2327_v21  ;;  %v2331_v23 = vld [vmem:[%s2698_s7] ss:$36 sps:$4 sm:$0xff] (!%p324_p9)   ;;  %v2332_v24 = vld [vmem:[%s2698_s7 + $0x8] ss:$36 sps:$4 sm:$0xff] (!%p324_p9)   ;;  %543 = vmatprep.subr.bf16.mxu1 (!%p324_p9), %v2329_v22  ;;  %v2340_v36 = vld [vmem:[%s2698_s7 + $0x10] ss:$36 sps:$4 sm:$0xff] (!%p324_p9)  }
  0x4a   : > { %v2333_v26 = vld [vmem:[%s2698_s7 + $0x4c] ss:$36 sps:$4 sm:$0x1f] (!%p324_p9)   ;;  %1808 = vperm.xlu0 (!%p324_p9), %2326, %v1800_v20   ;;  %501 = vmatpush1.bf16.msra.mxu0 (!%p324_p9), %v2331_v23  ;;  %v2335_v27 = vld [vmem:[%s2698_s7 + $0x54] ss:$36 sps:$4 sm:$0x1f] (!%p324_p9)  }
  0x4b   : > { %544 = vmatpush1.bf16.msra.mxu1 %v2332_v24  ;;  %v477_v28 = vand.u32 %v2333_v26, %v2704_v25  ;;  %v2337_v29 = vld [vmem:[%s2698_s7 + $0x48] ss:$36 sps:$4 sm:$0x1f]   ;;  %v2338_v30 = vld [vmem:[%s2698_s7 + $0x50] ss:$36 sps:$4 sm:$0x1f]   ;;  %v483_v31 = vand.u32 %v2335_v27, %v2704_v25 }
  0x4c   : > { %v474_v34 = vand.u32 %v2337_v29, %v2704_v25  ;;  %v480_v35 = vand.u32 %v2338_v30, %v2704_v25  ;;  %v2343_v37 = vld [vmem:[%s2698_s7 + $0x18] ss:$36 sps:$4 sm:$0xff]   ;;  %v2349_v41 = vld [vmem:[%s2698_s7 + $0x60] ss:$36 sps:$4 sm:$0x1f]   ;;  %s2988_s11 = scalar_lea.vmem [#allocation3], %s2297_s10 }
  0x4d   : > { %502 = vmatprep.subr.bf16.mxu0 %v477_v28  ;;  %545 = vmatprep.subr.bf16.mxu1 %v483_v31  ;;  %v2345_v38 = vld [vmem:[%s2698_s7 + $0x1c] ss:$36 sps:$4 sm:$0xff]   ;;  %v2351_v43 = vld [vmem:[%s2698_s7 + $0x64] ss:$36 sps:$4 sm:$0x1f]   ;;  %v492_v46 = vand.u32 %v2349_v41, %v2704_v25  ;;  %s2250_s12 = smul.u32 (%p2510_p5), 36, %s2031_s15 }
  0x4e   : > { %503 = vmatpush1.bf16.msra.mxu0 %v474_v34  ;;  %v2346_v39 = vld [vmem:[%s2698_s7 + $0x58] ss:$36 sps:$4 sm:$0x1f]   ;;  %v495_v44 = vand.u32 %v2351_v43, %v2704_v25  ;;  %v2352_v48 = vld [vmem:[%s2698_s7 + $0x90] ss:$36 sps:$4 sm:$0xff]  }
  0x4f   : > { %546 = vmatpush1.bf16.msra.mxu1 %v480_v35  ;;  %v2348_v40 = vld [vmem:[%s2698_s7 + $0x5c] ss:$36 sps:$4 sm:$0x1f]   ;;  %586 = vmatprep.subr.bf16.mxu0 %v2342_v33  ;;  %v486_v45 = vand.u32 %v2346_v39, %v2704_v25  ;;  %v2354_v47 = vld [vmem:[%s2698_s7 + $0x94] ss:$36 sps:$4 sm:$0xff]   ;;  %s1922_s14 = scalar_lea.vmem (%p2510_p5), %s3053_s3, %s2250_s12 }
  0x50   : > { %629 = vmatprep.subr.bf16.mxu1 %v2345_v38  ;;  %v489_v42 = vand.u32 %v2348_v40, %v2704_v25  ;;  %v2358_v49 = vld [vmem:[%s2698_s7 + $0xdc] ss:$36 sps:$4 sm:$0x1f]   ;;  %v2359_v52 = vld [vmem:[%s2698_s7 + $0x68] ss:$36 sps:$4 sm:$0x1f]  }
  0x51   : > { %2088 = vmatmul.mubr.msk.bf16.vlgmr.msra.gmra.mrb[0].mxu0 %vm465_vm2, %v2715_v32  ;;  %v2356_v50 = vld [vmem:[%s2698_s7 + $0xd8] ss:$36 sps:$4 sm:$0x1f]   ;;  %v2355_v51 = vld [vmem:[%s2698_s7 + $0x20] ss:$36 sps:$4 sm:$0xff]   ;;  %v821_v54 = vand.u32 %v2358_v49, %v2704_v25  ;;  %v498_v55 = vand.u32 %v2359_v52, %v2704_v25 }
  0x52   : > { %2089 = vmatmul.mubr.msk.bf16.vlgmr.msra.gmra.mrb[0].mxu1 %vm465_vm2, %v2715_v32  ;;  %587 = vmatpush1.bf16.msra.mxu0 %v2340_v36  ;;  %v818_v56 = vand.u32 %v2356_v50, %v2704_v25  ;;  %v2362_v57 = vld [vmem:[%s2698_s7 + $0x9c] ss:$36 sps:$4 sm:$0xff]   ;;  %v2368_v58 = vld [vmem:[%s2698_s7 + $0xe4] ss:$36 sps:$4 sm:$0x1f]  }
  0x53   : > { %630 = vmatpush1.bf16.msra.mxu1 %v2343_v37  ;;  %588 = vmatprep.subr.bf16.mxu0 %v489_v42  ;;  %v2365_v59 = vld [vmem:[%s2698_s7 + $0xa4] ss:$36 sps:$4 sm:$0xff]   ;;  %v2371_v60 = vld [vmem:[%s2698_s7 + $0xec] ss:$36 sps:$4 sm:$0x1f]   ;;  %v827_v1 = vand.u32 %v2368_v58, %v2704_v25 }
  0x54   : > { %618 = vmatprep.mubr.bf16.mxu0 %v2456_v17  ;;  %631 = vmatprep.subr.bf16.mxu1 %v495_v44  ;;  %v2360_v61 = vld [vmem:[%s2698_s7 + $0x98] ss:$36 sps:$4 sm:$0xff]   ;;  %v2363_v62 = vld [vmem:[%s2698_s7 + $0xa0] ss:$36 sps:$4 sm:$0xff]   ;;  %v833_v2 = vand.u32 %v2371_v60, %v2704_v25  ;;  %v2374_v5 = vld [vmem:[%s2698_s7 + $0xac] ss:$36 sps:$4 sm:$0xff]  }
  0x55   : > { %661 = vmatprep.mubr.bf16.mxu1 %v2456_v17  ;;  %v2366_v63 = vld [vmem:[%s2698_s7 + $0xe0] ss:$36 sps:$4 sm:$0x1f]   ;;  %v2369_v0 = vld [vmem:[%s2698_s7 + $0xe8] ss:$36 sps:$4 sm:$0x1f]  }
  0x56   : > { %589 = vmatpush1.bf16.msra.mxu0 %v486_v45  ;;  %v824_v3 = vand.u32 %v2366_v63, %v2704_v25  ;;  %v830_v4 = vand.u32 %v2369_v0, %v2704_v25  ;;  %v2378_v6 = vld [vmem:[%s2698_s7 + $0xf4] ss:$36 sps:$4 sm:$0x1f]   ;;  %v2372_v7 = vld [vmem:[%s2698_s7 + $0xa8] ss:$36 sps:$4 sm:$0xff]  }
  0x57   : > { %632 = vmatpush1.bf16.msra.mxu1 %v492_v46  ;;  %2263 = vmatprep.subr.bf16.mxu0 %v2458_v53  ;;  %v2375_v8 = vld [vmem:[%s2698_s7 + $0xb0] ss:$36 sps:$4 sm:$0xff]   ;;  %v2379_v10 = vld [vmem:[%s2698_s7 + $0xf8] ss:$36 sps:$4 sm:$0x1f]   ;;  %v839_v11 = vand.u32 %v2378_v6, %v2704_v25 }
  0x58   : > { %844 = vmatprep.subr.bf16.mxu1 %v2354_v47  ;;  %v2376_v9 = vld [vmem:[%s2698_s7 + $0xf0] ss:$36 sps:$4 sm:$0x1f]   ;;  %v842_v13 = vand.u32 %v2379_v10, %v2704_v25  ;;  %v2382_v14 = vld [vmem:[%s2698_s7 + $0x124] ss:$36 sps:$4 sm:$0xff]  }
  0x59   : > { %2090 = vmatmul.mubr.msk.bf16.vlgmr.msra.gmra.mrb[4].mxu0 %vm465_vm2, %v2715_v32  ;;  %v836_v12 = vand.u32 %v2376_v9, %v2704_v25  ;;  %v2388_v15 = vld [vmem:[%s2698_s7 + $0x16c] ss:$36 sps:$4 sm:$0x1f]   ;;  %v2391_v18 = vld [vmem:[%s2698_s7 + $0x174] ss:$36 sps:$4 sm:$0x1f]  }
  0x5a   : > { %2091 = vmatmul.mubr.msk.bf16.vlgmr.msra.gmra.mrb[4].mxu1 %vm465_vm2, %v2715_v32  ;;  %2264 = vmatpush3.bf16.msra.mxu0 %v2355_v51  ;;  %v2385_v16 = vld [vmem:[%s2698_s7 + $0x12c] ss:$36 sps:$4 sm:$0xff]   ;;  %v2380_v19 = vld [vmem:[%s2698_s7 + $0x120] ss:$36 sps:$4 sm:$0xff]   ;;  %v1183_v23 = vand.u32 %v2388_v15, %v2704_v25  ;;  %v1189_v24 = vand.u32 %v2391_v18, %v2704_v25  ;;  %v2394_v26 = vld [vmem:[%s2698_s7 + $0x134] ss:$36 sps:$4 sm:$0xff]  }
  0x5b   : > { %845 = vmatpush1.bf16.msra.mxu1 %v2352_v48  ;;  %2265 = vmatprep.subr.bf16.mxu0 %v2458_v53  ;;  %v2383_v20 = vld [vmem:[%s2698_s7 + $0x128] ss:$36 sps:$4 sm:$0xff]   ;;  %v2389_v22 = vld [vmem:[%s2698_s7 + $0x170] ss:$36 sps:$4 sm:$0x1f]  }
  0x5c   : > { %846 = vmatprep.subr.bf16.mxu1 %v821_v54  ;;  %2267 = vmatprep.mubr.msk.bf16.mxu0 %vm2459_vm3, %v2458_v53  ;;  %v2386_v21 = vld [vmem:[%s2698_s7 + $0x168] ss:$36 sps:$4 sm:$0x1f]   ;;  %v2397_v27 = vld [vmem:[%s2698_s7 + $0x13c] ss:$36 sps:$4 sm:$0xff]   ;;  %v1186_v30 = vand.u32 %v2389_v22, %v2704_v25 }
  0x5d   : > { %876 = vmatprep.mubr.bf16.mxu1 %v2456_v17  ;;  %v2400_v28 = vld [vmem:[%s2698_s7 + $0x17c] ss:$36 sps:$4 sm:$0x1f]   ;;  %v1180_v29 = vand.u32 %v2386_v21, %v2704_v25  ;;  %v2403_v33 = vld [vmem:[%s2698_s7 + $0x184] ss:$36 sps:$4 sm:$0x1f]  }
  0x5e   : > { %2266 = vmatpush3.bf16.msra.mxu0 %v498_v55  ;;  %v2811_v31 = vld [vmem:[%s2698_s7 + $0x200] ss:$36 sps:$4 sm:$0x1f]   ;;  %v2392_v34 = vld [vmem:[%s2698_s7 + $0x130] ss:$36 sps:$4 sm:$0xff]   ;;  %v1195_v41 = vand.u32 %v2400_v28, %v2704_v25  ;;  %v1201_v42 = vand.u32 %v2403_v33, %v2704_v25 }
  0x5f   : > { %847 = vmatpush1.bf16.msra.mxu1 %v818_v56  ;;  %887 = vmatprep.subr.bf16.mxu0 %v2362_v57  ;;  %v2398_v35 = vld [vmem:[%s2698_s7 + $0x178] ss:$36 sps:$4 sm:$0x1f]   ;;  %v2819_v36 = vld [vmem:[%s2698_s7 + $0x208] ss:$36 sps:$4 sm:$0x1f]   ;;  %v1548_v37 = vand.u32 %v2811_v31, %v2704_v25 }
  0x60   : > { %930 = vmatprep.subr.bf16.mxu1 %v2365_v59  ;;  %v2401_v38 = vld [vmem:[%s2698_s7 + $0x180] ss:$36 sps:$4 sm:$0x1f]   ;;  %v2395_v39 = vld [vmem:[%s2698_s7 + $0x138] ss:$36 sps:$4 sm:$0xff]   ;;  %v1554_v40 = vand.u32 %v2819_v36, %v2704_v25  ;;  %v1192_v45 = vand.u32 %v2398_v35, %v2704_v25 }
  0x61   : > { %2268 = vmatmul.mubr.msk.bf16.vlgmr.msra.gmra.mrb[8].mxu0 %vm465_vm2, %v2715_v32  ;;  %v2830_v43 = vld [vmem:[%s2698_s7 + $0x210] ss:$36 sps:$4 sm:$0x1f]   ;;  %v1198_v46 = vand.u32 %v2401_v38, %v2704_v25  ;;  %v2846_v49 = vld [vmem:[%s2698_s7 + $0x218] ss:$36 sps:$4 sm:$0x1f]  }
  0x62   : > { %2131 = vmatmul.mubr.msk.bf16.vlgmr.msra.gmra.mrb[8].mxu1 %vm465_vm2, %v2715_v32  ;;  %888 = vmatpush1.bf16.msra.mxu0 %v2360_v61  ;;  %v2833_v44 = vld [vmem:[%s2698_s7 + $0x214] ss:$36 sps:$4 sm:$0x1f]   ;;  %v1560_v48 = vand.u32 %v2830_v43, %v2704_v25  ;;  %v2410_v51 = vld [vmem:[%s2698_s7 + $0x1fc] ss:$36 sps:$4 sm:$0x1f]   ;;  %v1566_v52 = vand.u32 %v2846_v49, %v2704_v25 }
  0x63   : > { %931 = vmatpush1.bf16.msra.mxu1 %v2363_v62  ;;  %889 = vmatprep.subr.bf16.mxu0 %v827_v1  ;;  %v1563_v47 = vand.u32 %v2833_v44, %v2704_v25  ;;  %v2406_v50 = vld [vmem:[%s2698_s7 + $0x1b4] ss:$36 sps:$4 sm:$0xff]   ;;  %v2407_v55 = vld [vmem:[%s2698_s7 + $0x140] ss:$36 sps:$4 sm:$0xff]   ;;  %v1545_v58 = vand.u32 %v2410_v51, %v2704_v25  ;;  %v2424_v6 = vld [vmem:[%s2698_s7 + $0x1c8] ss:$36 sps:$4 sm:$0xff]  }
  0x64   : > { %932 = vmatprep.subr.bf16.mxu1 %v833_v2  ;;  %919 = vmatprep.mubr.bf16.mxu0 %v2456_v17  ;;  %v2404_v54 = vld [vmem:[%s2698_s7 + $0x1b0] ss:$36 sps:$4 sm:$0xff]   ;;  %v2408_v56 = vld [vmem:[%s2698_s7 + $0x1f8] ss:$36 sps:$4 sm:$0x1f]  }
  0x65   : > { %962 = vmatprep.mubr.bf16.mxu1 %v2456_v17  ;;  %v2411_v57 = vld [vmem:[%s2698_s7 + $0x188] ss:$36 sps:$4 sm:$0x1f]   ;;  %v1542_v60 = vand.u32 %v2408_v56, %v2704_v25  ;;  %v2414_v61 = vld [vmem:[%s2698_s7 + $0x1bc] ss:$36 sps:$4 sm:$0xff]  }
  0x66   : > { %890 = vmatpush1.bf16.msra.mxu0 %v824_v3  ;;  %v1204_v59 = vand.u32 %v2411_v57, %v2704_v25  ;;  %v2417_v62 = vld [vmem:[%s2698_s7 + $0x1c4] ss:$36 sps:$4 sm:$0xff]   ;;  %v2423_v0 = vld [vmem:[%s2698_s7 + $0x20c] ss:$36 sps:$4 sm:$0x1f]  }
  0x67   : > { %933 = vmatpush1.bf16.msra.mxu1 %v830_v4  ;;  %973 = vmatprep.subr.bf16.mxu0 %v2374_v5  ;;  %v2420_v63 = vld [vmem:[%s2698_s7 + $0x204] ss:$36 sps:$4 sm:$0x1f]   ;;  %v2412_v1 = vld [vmem:[%s2698_s7 + $0x1b8] ss:$36 sps:$4 sm:$0xff]   ;;  %v1557_v4 = vand.u32 %v2423_v0, %v2704_v25 }
  0x68   : > { %2271 = vmatprep.subr.bf16.mxu1 %v2458_v53  ;;  %v2415_v2 = vld [vmem:[%s2698_s7 + $0x1c0] ss:$36 sps:$4 sm:$0xff]   ;;  %v1551_v3 = vand.u32 %v2420_v63, %v2704_v25  ;;  %v2426_v5 = vld [vmem:[%s2698_s7 + $0x1cc] ss:$36 sps:$4 sm:$0xff]  }
  0x69   : > { %2132 = vmatmul.mubr.msk.bf16.vlgmr.msra.gmra.mrb[12].mxu0 %vm465_vm2, %v2715_v32 }
  0x6a   : > { %2133 = vmatmul.mubr.msk.bf16.vlgmr.msra.gmra.mrb[12].mxu1 %vm465_vm2, %v2715_v32  ;;  %974 = vmatpush1.bf16.msra.mxu0 %v2372_v7  ;;  %v2427_v7 = vld [vmem:[%s2698_s7 + $0x1d0] ss:$36 sps:$4 sm:$0xff]  }
  0x6b   : > { %2272 = vmatpush3.bf16.msra.mxu1 %v2375_v8  ;;  %975 = vmatprep.subr.bf16.mxu0 %v839_v11 }
  0x6c   : > { %2273 = vmatprep.subr.bf16.mxu1 %v2458_v53  ;;  %1005 = vmatprep.mubr.bf16.mxu0 %v2456_v17 }
  0x6d   : > { %2275 = vmatprep.mubr.msk.bf16.mxu1 %vm2459_vm3, %v2458_v53 }
  0x6e   : > { %976 = vmatpush1.bf16.msra.mxu0 %v836_v12 }
  0x6f   : > { %2274 = vmatpush3.bf16.msra.mxu1 %v842_v13  ;;  %1206 = vmatprep.subr.bf16.mxu0 %v2382_v14 }
  0x70   : > { %1249 = vmatprep.subr.bf16.mxu1 %v2385_v16 }
  0x71   : > { %2134 = vmatmul.mubr.msk.bf16.vlgmr.msra.gmra.mrb[16].mxu0 %vm465_vm2, %v2715_v32 }
  0x72   : > { %2276 = vmatmul.mubr.msk.bf16.vlgmr.msra.gmra.mrb[16].mxu1 %vm465_vm2, %v2715_v32  ;;  %1207 = vmatpush1.bf16.msra.mxu0 %v2380_v19 }
  0x73   : > { %1250 = vmatpush1.bf16.msra.mxu1 %v2383_v20  ;;  %1208 = vmatprep.subr.bf16.mxu0 %v1183_v23 }
  0x74   : > { %1251 = vmatprep.subr.bf16.mxu1 %v1189_v24  ;;  %1238 = vmatprep.mubr.bf16.mxu0 %v2456_v17 }
  0x75   : > { %1281 = vmatprep.mubr.bf16.mxu1 %v2456_v17 }
  0x76   : > { %1209 = vmatpush1.bf16.msra.mxu0 %v1180_v29 }
  0x77   : > { %1252 = vmatpush1.bf16.msra.mxu1 %v1186_v30  ;;  %1292 = vmatprep.subr.bf16.mxu0 %v2394_v26 }
  0x78   : > { %1335 = vmatprep.subr.bf16.mxu1 %v2397_v27 }
  0x79   : > { %2174 = vmatmul.mubr.msk.bf16.vlgmr.msra.gmra.mrb[20].mxu0 %vm465_vm2, %v2715_v32 }
  0x7a   : > { %2175 = vmatmul.mubr.msk.bf16.vlgmr.msra.gmra.mrb[20].mxu1 %vm465_vm2, %v2715_v32  ;;  %1293 = vmatpush1.bf16.msra.mxu0 %v2392_v34 }
  0x7b   : > { %1336 = vmatpush1.bf16.msra.mxu1 %v2395_v39  ;;  %1294 = vmatprep.subr.bf16.mxu0 %v1195_v41 }
  0x7c   : > { %1337 = vmatprep.subr.bf16.mxu1 %v1201_v42  ;;  %1324 = vmatprep.mubr.bf16.mxu0 %v2456_v17 }
  0x7d   : > { %1367 = vmatprep.mubr.bf16.mxu1 %v2456_v17 }
  0x7e   : > { %1295 = vmatpush1.bf16.msra.mxu0 %v1192_v45 }
  0x7f   : > { %1338 = vmatpush1.bf16.msra.mxu1 %v1198_v46  ;;  %2279 = vmatprep.subr.bf16.mxu0 %v2458_v53 }
  0x80   : > { %1568 = vmatprep.subr.bf16.mxu1 %v2406_v50 }
  0x81   : > { %2176 = vmatmul.mubr.msk.bf16.vlgmr.msra.gmra.mrb[24].mxu0 %vm465_vm2, %v2715_v32 }
  0x82   : > { %2177 = vmatmul.mubr.msk.bf16.vlgmr.msra.gmra.mrb[24].mxu1 %vm465_vm2, %v2715_v32  ;;  %2280 = vmatpush3.bf16.msra.mxu0 %v2407_v55 }
  0x83   : > { %1569 = vmatpush1.bf16.msra.mxu1 %v2404_v54  ;;  %2281 = vmatprep.subr.bf16.mxu0 %v2458_v53 }
  0x84   : > { %1570 = vmatprep.subr.bf16.mxu1 %v1545_v58  ;;  %2283 = vmatprep.mubr.msk.bf16.mxu0 %vm2459_vm3, %v2458_v53 }
  0x85   : > { %1600 = vmatprep.mubr.bf16.mxu1 %v2456_v17 }
  0x86   : > { %2282 = vmatpush3.bf16.msra.mxu0 %v1204_v59 }
  0x87   : > { %1571 = vmatpush1.bf16.msra.mxu1 %v1542_v60  ;;  %1611 = vmatprep.subr.bf16.mxu0 %v2414_v61 }
  0x88   : > { %1654 = vmatprep.subr.bf16.mxu1 %v2417_v62 }
  0x89   : > { %2284 = vmatmul.mubr.msk.bf16.vlgmr.msra.gmra.mrb[28].mxu0 %vm465_vm2, %v2715_v32 }
  0x8a   : > { %2217 = vmatmul.mubr.msk.bf16.vlgmr.msra.gmra.mrb[28].mxu1 %vm465_vm2, %v2715_v32  ;;  %1612 = vmatpush1.bf16.msra.mxu0 %v2412_v1 }
  0x8b   : > { %1655 = vmatpush1.bf16.msra.mxu1 %v2415_v2  ;;  %1613 = vmatprep.subr.bf16.mxu0 %v1551_v3 }
  0x8c   : > { %1656 = vmatprep.subr.bf16.mxu1 %v1557_v4  ;;  %1643 = vmatprep.mubr.bf16.mxu0 %v2456_v17 }
  0x8d   : > { %1686 = vmatprep.mubr.bf16.mxu1 %v2456_v17 }
  0x8e   : > { %1614 = vmatpush1.bf16.msra.mxu0 %v1548_v37 }
  0x8f   : > { %1657 = vmatpush1.bf16.msra.mxu1 %v1554_v40  ;;  %1697 = vmatprep.subr.bf16.mxu0 %v2426_v5 }
  0x90   : > { %2287 = vmatprep.subr.bf16.mxu1 %v2458_v53 }
  0x91   : > { %2218 = vmatmul.mubr.msk.bf16.vlgmr.msra.gmra.mrb[32].mxu0 %vm465_vm2, %v2715_v32 }
  0x92   : > { %2219 = vmatmul.mubr.msk.bf16.vlgmr.msra.gmra.mrb[32].mxu1 %vm465_vm2, %v2715_v32  ;;  %1698 = vmatpush1.bf16.msra.mxu0 %v2424_v6 }
  0x93   : > { %2288 = vmatpush3.bf16.msra.mxu1 %v2427_v7  ;;  %1699 = vmatprep.subr.bf16.mxu0 %v1563_v47 }
  0x94   : > { %2289 = vmatprep.subr.bf16.mxu1 %v2458_v53  ;;  %1729 = vmatprep.mubr.bf16.mxu0 %v2456_v17 }
  0x95   : > { %2291 = vmatprep.mubr.msk.bf16.mxu1 %vm2459_vm3, %v2458_v53 }
  0x96   : > { %1700 = vmatpush1.bf16.msra.mxu0 %v1560_v48 }
  0x97   : > { %2290 = vmatpush3.bf16.msra.mxu1 %v1566_v52 }
  0x99   : > { %2220 = vmatmul.mubr.msk.bf16.vlgmr.msra.gmra.mrb[36].mxu0 %vm465_vm2, %v2715_v32 }
  0x9a   : > { %2292 = vmatmul.mubr.msk.bf16.vlgmr.msra.gmra.mrb[36].mxu1 %vm465_vm2, %v2715_v32 }
 0x124   : > { %v534_v8 = vpop.f32.mrb[0].mxu0 }
 0x125   : > { %v577_v9 = vpop.f32.mrb[0].mxu1  ;;  %v2909_v10 = vpop.f32.mrb[1].mxu0 }
 0x126   : > { %v2911_v11 = vpop.f32.mrb[1].mxu1  ;;  %v2913_v17 = vpop.f32.mrb[2].mxu0 }
 0x127   : > { %v2915_v53 = vpop.f32.mrb[2].mxu1  ;;  %v2917_v12 = vpop.f32.mrb[3].mxu0 }
 0x128   : > { %v2919_v25 = vpop.f32.mrb[3].mxu1 }
 0x12c   : > { %v2921_v13 = vpop.f32.mrb[4].mxu0 }
 0x12d   : > { %v2923_v14 = vpop.f32.mrb[4].mxu1  ;;  %v2925_v15 = vpop.f32.mrb[5].mxu0 }
 0x12e   : > { %v2927_v32 = vpop.f32.mrb[5].mxu1  ;;  %v2929_v16 = vpop.f32.mrb[6].mxu0 }
 0x12f   : > { %v2931_v18 = vpop.f32.mrb[6].mxu1  ;;  %v2933_v19 = vpop.f32.mrb[7].mxu0 }
 0x130   : > { %v2935_v20 = vpop.f32.mrb[7].mxu1 }
 0x134   : > { %v2937_v21 = vpop.f32.mrb[8].mxu0 }
 0x135   : > { %v878_v22 = vpop.f32.mrb[8].mxu1  ;;  %v2269_v24 = vpop.f32.mrb[9].mxu0 }
 0x136   : > { %v1057_v23 = vmax.f32 %v534_v8, %v878_v22  ;;  %v880_v26 = vpop.f32.mrb[9].mxu1  ;;  %v2940_v28 = vpop.f32.mrb[10].mxu0 }
 0x137   : > { %v1058_v27 = vmax.f32 %v2909_v10, %v880_v26  ;;  %v882_v29 = vpop.f32.mrb[10].mxu1  ;;  %v2270_v31 = vpop.f32.mrb[11].mxu0 }
 0x138   : > { %v1066_v30 = vmax.f32 %v2913_v17, %v882_v29  ;;  %v884_v33 = vpop.f32.mrb[11].mxu1 }
 0x139   : > { %v1067_v34 = vmax.f32 %v2917_v12, %v884_v33 }
 0x13c   : > { %v921_v35 = vpop.f32.mrb[12].mxu0 }
 0x13d   : > { %v964_v36 = vpop.f32.mrb[12].mxu1  ;;  %v1059_v37 = vmax.f32 %v577_v9, %v921_v35  ;;  %v923_v39 = vpop.f32.mrb[13].mxu0 }
 0x13e   : > { %v1061_v38 = vmax.f32 %v2921_v13, %v964_v36  ;;  %v966_v40 = vpop.f32.mrb[13].mxu1  ;;  %v1060_v41 = vmax.f32 %v2911_v11, %v923_v39  ;;  %v925_v43 = vpop.f32.mrb[14].mxu0 }
 0x13f   : > { %v1062_v42 = vmax.f32 %v2925_v15, %v966_v40  ;;  %v968_v44 = vpop.f32.mrb[14].mxu1  ;;  %v1068_v45 = vmax.f32 %v2915_v53, %v925_v43  ;;  %v927_v47 = vpop.f32.mrb[15].mxu0 }
 0x140   : > { %v1070_v46 = vmax.f32 %v2929_v16, %v968_v44  ;;  %v970_v48 = vpop.f32.mrb[15].mxu1  ;;  %v1069_v49 = vmax.f32 %v2919_v25, %v927_v47  ;;  %v2965_v15 = vpop.permute.xlu0 %1803 }
 0x141   : > { %v1071_v50 = vmax.f32 %v2933_v19, %v970_v48 }
 0x144   : > { %v1007_v51 = vpop.f32.mrb[16].mxu0 }
 0x145   : > { %v1050_v52 = vpop.f32.mrb[16].mxu1  ;;  %v1063_v54 = vmax.f32 %v2923_v14, %v1007_v51  ;;  %v1009_v56 = vpop.f32.mrb[17].mxu0 }
 0x146   : > { %v1065_v55 = vmax.f32 %v2937_v21, %v1050_v52  ;;  %v2277_v57 = vpop.f32.mrb[17].mxu1  ;;  %v1064_v58 = vmax.f32 %v2927_v32, %v1009_v56  ;;  %v1011_v59 = vpop.f32.mrb[18].mxu0 }
 0x147   : > { %v1053_v60 = vpop.f32.mrb[18].mxu1  ;;  %v1072_v61 = vmax.f32 %v2931_v18, %v1011_v59  ;;  %v1013_v63 = vpop.f32.mrb[19].mxu0 }
 0x148   : > { %v1074_v62 = vmax.f32 %v2940_v28, %v1053_v60  ;;  %v2278_v0 = vpop.f32.mrb[19].mxu1  ;;  %v1073_v1 = vmax.f32 %v2935_v20, %v1013_v63 }
 0x14c   : > { %v1240_v2 = vpop.f32.mrb[20].mxu0 }
 0x14d   : > { %v1283_v3 = vpop.f32.mrb[20].mxu1  ;;  %v1419_v4 = vmax.f32 %v1057_v23, %v1240_v2  ;;  %v1242_v6 = vpop.f32.mrb[21].mxu0 }
 0x14e   : > { %v2957_v5 = vmax.f32 %v1059_v37, %v1283_v3  ;;  %v1285_v7 = vpop.f32.mrb[21].mxu1  ;;  %v1420_v8 = vmax.f32 %v1058_v27, %v1242_v6  ;;  %v1244_v10 = vpop.f32.mrb[22].mxu0 }
 0x14f   : > { %v2959_v9 = vmax.f32 %v1060_v41, %v1285_v7  ;;  %v1287_v11 = vpop.f32.mrb[22].mxu1  ;;  %v1428_v17 = vmax.f32 %v1066_v30, %v1244_v10  ;;  %v1246_v12 = vpop.f32.mrb[23].mxu0 }
 0x150   : > { %v2961_v53 = vmax.f32 %v1068_v45, %v1287_v11  ;;  %v1289_v25 = vpop.f32.mrb[23].mxu1  ;;  %v1429_v13 = vmax.f32 %v1067_v34, %v1246_v12  ;;  %v2975_v34 = vpop.permute.xlu0 %1808 }
 0x151   : > { %v2963_v14 = vmax.f32 %v1069_v49, %v1289_v25 }
 0x154   : > { %v1326_v32 = vpop.f32.mrb[24].mxu0 }
 0x155   : > { %v1369_v16 = vpop.f32.mrb[24].mxu1  ;;  %v1423_v18 = vmax.f32 %v1061_v38, %v1326_v32  ;;  %v1328_v20 = vpop.f32.mrb[25].mxu0 }
 0x156   : > { %v2967_v19 = vmax.f32 %v1063_v54, %v1369_v16  ;;  %v1371_v21 = vpop.f32.mrb[25].mxu1  ;;  %v1424_v22 = vmax.f32 %v1062_v42, %v1328_v20  ;;  %v1330_v24 = vpop.f32.mrb[26].mxu0 }
 0x157   : > { %v2969_v23 = vmax.f32 %v1064_v58, %v1371_v21  ;;  %v1373_v26 = vpop.f32.mrb[26].mxu1  ;;  %v1432_v27 = vmax.f32 %v1070_v46, %v1330_v24  ;;  %v1332_v29 = vpop.f32.mrb[27].mxu0 }
 0x158   : > { %v2971_v28 = vmax.f32 %v1072_v61, %v1373_v26  ;;  %v1375_v30 = vpop.f32.mrb[27].mxu1  ;;  %v1433_v31 = vmax.f32 %v1071_v50, %v1332_v29 }
 0x159   : > { %v2973_v33 = vmax.f32 %v1073_v1, %v1375_v30 }
 0x15c   : > { %v1412_v35 = vpop.f32.mrb[28].mxu0 }
 0x15d   : > { %v1602_v36 = vpop.f32.mrb[28].mxu1  ;;  %v2977_v37 = vmax.f32 %v1065_v55, %v1412_v35  ;;  %v2285_v39 = vpop.f32.mrb[29].mxu0 }
 0x15e   : > { %v1781_v38 = vmax.f32 %v1419_v4, %v1602_v36  ;;  %v1604_v40 = vpop.f32.mrb[29].mxu1  ;;  %v1415_v42 = vpop.f32.mrb[30].mxu0 }
 0x15f   : > { %v1782_v41 = vmax.f32 %v1420_v8, %v1604_v40  ;;  %v1606_v43 = vpop.f32.mrb[30].mxu1  ;;  %v2982_v45 = vmax.f32 %v1074_v62, %v1415_v42  ;;  %v2286_v47 = vpop.f32.mrb[31].mxu0 }
 0x160   : > { %v1811_v44 = vadd.f32 %v2965_v15, %v1781_v38  ;;  %v1790_v46 = vmax.f32 %v1428_v17, %v1606_v43  ;;  %v1608_v48 = vpop.f32.mrb[31].mxu1 }
 0x161   : > { %v1812_v49 = vadd.f32 %v2965_v15, %v1782_v41  ;;  %v1791_v50 = vmax.f32 %v1429_v13, %v1608_v48 }
 0x162   : > { %v1829_v51 = vmax.f32 %v1811_v44, 0.0  ;;  %v1820_v52 = vadd.f32 %v2975_v34, %v1790_v46 }
 0x163   : > { %v1830_v54 = vmax.f32 %v1812_v49, 0.0  ;;  %v1821_v55 = vadd.f32 %v2975_v34, %v1791_v50 }
 0x164   : > { %v1838_v56 = vmax.f32 %v1820_v52, 0.0  ;;  %v1645_v59 = vpop.f32.mrb[32].mxu0 }
 0x165   : > { %v2240_v57 = vpack.c.bf16 %v1830_v54, %v1829_v51  ;;  %v1839_v58 = vmax.f32 %v1821_v55, 0.0  ;;  %v1688_v60 = vpop.f32.mrb[32].mxu1  ;;  %v1783_v61 = vmax.f32 %v2957_v5, %v1645_v59  ;;  %v1647_v63 = vpop.f32.mrb[33].mxu0 }
 0x166   : > { %v1785_v62 = vmax.f32 %v1423_v18, %v1688_v60  ;;  %v1690_v0 = vpop.f32.mrb[33].mxu1  ;;  %v1784_v2 = vmax.f32 %v2959_v9, %v1647_v63  ;;  %v1649_v4 = vpop.f32.mrb[34].mxu0 }
 0x167   : > { %1903 = vst [vmem:[%s2988_s11] sm:$0xff] %v2240_v57  ;;  %v2245_v1 = vpack.c.bf16 %v1839_v58, %v1838_v56  ;;  %v1786_v3 = vmax.f32 %v1424_v22, %v1690_v0  ;;  %v1692_v6 = vpop.f32.mrb[34].mxu1  ;;  %v1813_v7 = vadd.f32 %v2965_v15, %v1783_v61  ;;  %v1792_v5 = vmax.f32 %v2961_v53, %v1649_v4  ;;  %v1651_v11 = vpop.f32.mrb[35].mxu0 }
 0x168   : > { %v1815_v8 = vadd.f32 %v2965_v15, %v1785_v62  ;;  %v1794_v10 = vmax.f32 %v1432_v27, %v1692_v6  ;;  %v1694_v17 = vpop.f32.mrb[35].mxu1  ;;  %v1814_v12 = vadd.f32 %v2965_v15, %v1784_v2  ;;  %v1793_v13 = vmax.f32 %v2963_v14, %v1651_v11 }
 0x169   : > { %1908 = vst [vmem:[%s2988_s11 + $0x24] sm:$0x11] %v2245_v1  ;;  %v1816_v25 = vadd.f32 %v2965_v15, %v1786_v3  ;;  %v1795_v9 = vmax.f32 %v1433_v31, %v1694_v17  ;;  %v1831_v32 = vmax.f32 %v1813_v7, 0.0  ;;  %v1822_v18 = vadd.f32 %v2975_v34, %v1792_v5 }
 0x16a   : > { %v1833_v16 = vmax.f32 %v1815_v8, 0.0  ;;  %v1824_v20 = vadd.f32 %v2975_v34, %v1794_v10  ;;  %v1832_v21 = vmax.f32 %v1814_v12, 0.0  ;;  %v1823_v22 = vadd.f32 %v2975_v34, %v1793_v13 }
 0x16b   : > { %v1834_v53 = vmax.f32 %v1816_v25, 0.0  ;;  %v1825_v24 = vadd.f32 %v2975_v34, %v1795_v9  ;;  %v1840_v26 = vmax.f32 %v1822_v18, 0.0 }
 0x16c   : > { %v1842_v27 = vmax.f32 %v1824_v20, 0.0  ;;  %v2241_v29 = vpack.c.bf16 %v1832_v21, %v1831_v32  ;;  %v1841_v14 = vmax.f32 %v1823_v22, 0.0  ;;  %v1731_v35 = vpop.f32.mrb[36].mxu0 }
 0x16d   : > { %v2242_v30 = vpack.c.bf16 %v1834_v53, %v1833_v16  ;;  %v1843_v31 = vmax.f32 %v1825_v24, 0.0  ;;  %v1774_v36 = vpop.f32.mrb[36].mxu1  ;;  %v1787_v38 = vmax.f32 %v2967_v19, %v1731_v35  ;;  %v1733_v40 = vpop.f32.mrb[37].mxu0 }
 0x16e   : > { %v1789_v39 = vmax.f32 %v2977_v37, %v1774_v36  ;;  %v2293_v41 = vpop.f32.mrb[37].mxu1  ;;  %1904 = vst [vmem:[%s2988_s11 + $0x8] sm:$0xff] %v2241_v29  ;;  %v2246_v42 = vpack.c.bf16 %v1841_v14, %v1840_v26  ;;  %v1788_v44 = vmax.f32 %v2969_v23, %v1733_v40  ;;  %v1735_v46 = vpop.f32.mrb[38].mxu0 }
 0x16f   : > { %1905 = vst [vmem:[%s2988_s11 + $0x10] sm:$0xff] %v2242_v30  ;;  %v2247_v43 = vpack.c.bf16 %v1843_v31, %v1842_v27  ;;  %v1777_v47 = vpop.f32.mrb[38].mxu1  ;;  %v1817_v48 = vadd.f32 %v2965_v15, %v1787_v38  ;;  %v1796_v19 = vmax.f32 %v2971_v28, %v1735_v46  ;;  %v1737_v50 = vpop.f32.mrb[39].mxu0 }
 0x170   : > { %v1819_v49 = vadd.f32 %v2965_v15, %v1789_v39  ;;  %v1798_v37 = vmax.f32 %v2982_v45, %v1777_v47  ;;  %v2294_v51 = vpop.f32.mrb[39].mxu1  ;;  %1909 = vst [vmem:[%s2988_s11 + $0x2c] sm:$0x11] %v2246_v42  ;;  %v1818_v52 = vadd.f32 %v2965_v15, %v1788_v44  ;;  %v1797_v23 = vmax.f32 %v2973_v33, %v1737_v50  ;;  %v1945_v2 = vld [vmem:[%s2988_s11 + $0x24] sm:$0xff] (%p2510_p5) }
 0x171   : > { %1910 = vst [vmem:[%s2988_s11 + $0x34] sm:$0x11] %v2247_v43  ;;  %v1835_v54 = vmax.f32 %v1817_v48, 0.0  ;;  %v1826_v56 = vadd.f32 %v2975_v34, %v1796_v19  ;;  %1946 = vst [vmem:[%s1922_s14 + $0x48] sm:$0xff] (%p2510_p5), %v1945_v2 }
 0x172   : > { %v1837_v55 = vmax.f32 %v1819_v49, 0.0  ;;  %v1828_v28 = vadd.f32 %v2975_v34, %v1798_v37  ;;  %v1836_v57 = vmax.f32 %v1818_v52, 0.0  ;;  %v1827_v45 = vadd.f32 %v2975_v34, %v1797_v23  ;;  %1919 = sbr.rel (!%p2510_p5) target bundleno = 385 (0x181), region = 62  ;;  %v1937_v34 = vld [vmem:[%s2988_s11] sm:$0xff] (%p2510_p5) }
 0x173   : > { %v1844_v59 = vmax.f32 %v1826_v56, 0.0  ;;  %1938 = vst [vmem:[%s1922_s14] sm:$0xff] (%p2510_p5), %v1937_v34 }
 0x174   : > { %v2244_v58 = vpack.c.bf16 %v1837_v55, %v1837_v55  ;;  %v1846_v60 = vmax.f32 %v1828_v28, 0.0  ;;  %v2243_v61 = vpack.c.bf16 %v1836_v57, %v1835_v54  ;;  %v1845_v62 = vmax.f32 %v1827_v45, 0.0 }
 0x175   : > { %v1939_v63 = vld [vmem:[%s2988_s11 + $0x8] sm:$0xff] (%p2510_p5) }
 0x176   : > { %1907 = vst [vmem:[%s2988_s11 + $0x20] sm:$0xf] %v2244_v58  ;;  %v2249_v15 = vpack.c.bf16 %v1846_v60, %v1846_v60  ;;  %1906 = vst [vmem:[%s2988_s11 + $0x18] sm:$0xff] %v2243_v61  ;;  %v2248_v33 = vpack.c.bf16 %v1845_v62, %v1844_v59  ;;  %v1941_v0 = vld [vmem:[%s2988_s11 + $0x10] sm:$0xff] (%p2510_p5) }
 0x177   : > { %v1947_v3 = vld [vmem:[%s2988_s11 + $0x2c] sm:$0xff] (%p2510_p5)  ;;  %1940 = vst [vmem:[%s1922_s14 + $0x8] sm:$0xff] (%p2510_p5), %v1939_v63  ;;  %1942 = vst [vmem:[%s1922_s14 + $0x10] sm:$0xff] (%p2510_p5), %v1941_v0 }
 0x178   : > { %1912 = vst [vmem:[%s2988_s11 + $0x44] sm:$0x1] %v2249_v15  ;;  %1911 = vst [vmem:[%s2988_s11 + $0x3c] sm:$0x11] %v2248_v33  ;;  %v1949_v4 = vld [vmem:[%s2988_s11 + $0x34] sm:$0xff] (%p2510_p5) }
 0x179   : > { %1948 = vst [vmem:[%s1922_s14 + $0x50] sm:$0xff] %v1947_v3  ;;  %1950 = vst [vmem:[%s1922_s14 + $0x58] sm:$0xff] %v1949_v4 }
 0x17d   : > { %v1943_v1 = vld [vmem:[%s2988_s11 + $0x18] sm:$0xff]  ;;  %v2233_v7 = vld [vmem:[%s2988_s11 + $0x20] sm:$0xf] }
 0x17e   : > { %1944 = vst [vmem:[%s1922_s14 + $0x18] sm:$0xff] %v1943_v1  ;;  %2234 = vst [vmem:[%s1922_s14 + $0x20] sm:$0xf] %v2233_v7 }
 0x17f   : > { %v1951_v6 = vld [vmem:[%s2988_s11 + $0x3c] sm:$0xff]  ;;  %v2235_v8 = vld [vmem:[%s2988_s11 + $0x44] sm:$0xf] }
 0x180   : > { %1952 = vst [vmem:[%s1922_s14 + $0x60] sm:$0xff] %v1951_v6  ;;  %2236 = vst [vmem:[%s1922_s14 + $0x68] sm:$0xf] %v2235_v8 }
 0x181 PF: > { %p10_p10 = scmp.ge.s32.totalorder %s2497_s16, 4   ;;  %s3055_s12 = smov %s2450_s13 }
 0x182   : > { %s3056_s13 = smov %s2508_s19  ;;  %s3057_s14 = smov %s2497_s16 }
 0x183   :  { %12 = sbr.rel (!%p10_p10) target bundleno = 2 (0x2), region = 134 }

// kernel: cnn_forward.4
= control target key start
LH: loop header
LB: loop body
LE: loop exit
PB: predicated region body
PF: predicated region fallthrough
CT: control target
= control target key end

     0   :  { %s2069_s12 = smov 0   ;;  %s2071_s13 = smov 0   ;;  %s2507_s0 = inlined_call_operand.vmem [shape: bf16[4,250,256], index: 0, kind: input, shape index: {}]   ;;  %s2508_s1 = inlined_call_operand.vmem [shape: bf16[20,250], index: 1, kind: input, shape index: {}]   ;;  %s2509_s2 = inlined_call_operand.vmem [shape: f32[20,1], index: 2, kind: input, shape index: {}]   ;;  %s2510_s3 = inlined_call_operand.vmem [shape: bf16[20,256], index: 3, kind: output, shape index: {}]  }
   0x1   :  { %s2073_s14 = smov 0  }
   0x2 LB: > { %s1617_s15 = sadd.s32 4294967295, %s2046_s14   ;;  %s2086_s16 = sadd.s32 1, %s2046_s14   ;;  %s2046_s14 = sphi %s2073_s14, %s2514_s14   ;;  %s2042_s13 = sphi %s2071_s13, %s2513_s13   ;;  %s2038_s12 = sphi %s2069_s12, %s2512_s12  }
   0x3   : > { %s17_s17 = ssub.s32 %s2046_s14, %s2086_s16  ;;  %s20_s18 = sadd.s32 1, %s2042_s13 }
   0x4   : > { %p18_p0 = scmp.eq.s32.totalorder %s17_s17, 0  ;;  %p27_p1 = scmp.ne.s32.totalorder %s2042_s13, %s2038_s12 }
   0x5   : > { %p28_p2 = scmp.eq.s32.totalorder %s2046_s14, 0  ;;  %p99_p3 = scmp.eq.s32.totalorder %s1617_s15, 1 }
   0x6   : > { %s2097_s19 = scalar_select %p18_p0, %s2042_s13, %s20_s18  }
   0x7   : > { %p29_p4 = por %p28_p2, %p27_p1  ;;  %p2099_p5 = por %p99_p3, %p27_p1 }
   0x8   : > { %p1620_p6 = scmp.ge.s32.totalorder %s2046_s14, 2 }
   0xa   : > { %127 = sbr.rel (%p1620_p6) target bundleno = 106 (0x6a), region = 24 }
  0x11   : > { %130 = sbr.rel (!%p29_p4) target bundleno = 106 (0x6a), region = 28  ;;  %s132_s21 = sand.u32 (%p29_p4), 1, %s2042_s13  }
  0x12   : > { %s1622_s22 = sshll.u32 (%p29_p4), %s2046_s14, 2  ;;  %s1621_s23 = sshll.u32 (%p29_p4), %s132_s21, 9 }
  0x13   : > { %s2109_s26 = scalar_lea.vmem (%p29_p4), %s2507_s0, %s1622_s22  ;;  %s2113_s27 = scalar_lea.vmem (%p29_p4), [#allocation2], %s1621_s23 }
  0x14   : > { %v152_v0 = vld [vmem:[%s2109_s26] sm:$0xf] (%p29_p4)  ;;  %v154_v1 = vld [vmem:[%s2109_s26 + $0x8] sm:$0xf] (%p29_p4)  ;;  %v156_v2 = vld [vmem:[%s2109_s26 + $0x10] sm:$0xf] (%p29_p4) }
  0x15   : > { %153 = vst [vmem:[%s2113_s27] sm:$0xf] (%p29_p4), %v152_v0  ;;  %155 = vst [vmem:[%s2113_s27 + $0x4] sm:$0xf] (%p29_p4), %v154_v1  ;;  %v158_v3 = vld [vmem:[%s2109_s26 + $0x18] sm:$0xf] (%p29_p4) }
  0x16   : > { %v160_v4 = vld [vmem:[%s2109_s26 + $0x20] sm:$0xf] (%p29_p4)  ;;  %157 = vst [vmem:[%s2113_s27 + $0x8] sm:$0xf] (%p29_p4), %v156_v2  ;;  %159 = vst [vmem:[%s2113_s27 + $0xc] sm:$0xf] (%p29_p4), %v158_v3 }
  0x17   : > { %161 = vst [vmem:[%s2113_s27 + $0x10] sm:$0xf] (%p29_p4), %v160_v4  ;;  %v162_v5 = vld [vmem:[%s2109_s26 + $0x28] sm:$0xf] (%p29_p4)  ;;  %v164_v6 = vld [vmem:[%s2109_s26 + $0x30] sm:$0xf] (%p29_p4) }
  0x18   : > { %v166_v7 = vld [vmem:[%s2109_s26 + $0x38] sm:$0xf]  ;;  %163 = vst [vmem:[%s2113_s27 + $0x14] sm:$0xf] %v162_v5  ;;  %165 = vst [vmem:[%s2113_s27 + $0x18] sm:$0xf] %v164_v6 }
  0x19   : > { %167 = vst [vmem:[%s2113_s27 + $0x1c] sm:$0xf] %v166_v7  ;;  %v168_v8 = vld [vmem:[%s2109_s26 + $0x40] sm:$0xf]  ;;  %v170_v9 = vld [vmem:[%s2109_s26 + $0x48] sm:$0xf] }
  0x1a   : > { %v172_v10 = vld [vmem:[%s2109_s26 + $0x50] sm:$0xf]  ;;  %169 = vst [vmem:[%s2113_s27 + $0x20] sm:$0xf] %v168_v8  ;;  %171 = vst [vmem:[%s2113_s27 + $0x24] sm:$0xf] %v170_v9 }
  0x1b   : > { %173 = vst [vmem:[%s2113_s27 + $0x28] sm:$0xf] %v172_v10  ;;  %v174_v11 = vld [vmem:[%s2109_s26 + $0x58] sm:$0xf]  ;;  %v176_v12 = vld [vmem:[%s2109_s26 + $0x60] sm:$0xf] }
  0x1c   : > { %v178_v13 = vld [vmem:[%s2109_s26 + $0x68] sm:$0xf]  ;;  %175 = vst [vmem:[%s2113_s27 + $0x2c] sm:$0xf] %v174_v11  ;;  %177 = vst [vmem:[%s2113_s27 + $0x30] sm:$0xf] %v176_v12 }
  0x1d   : > { %179 = vst [vmem:[%s2113_s27 + $0x34] sm:$0xf] %v178_v13  ;;  %v180_v14 = vld [vmem:[%s2109_s26 + $0x70] sm:$0xf]  ;;  %v182_v15 = vld [vmem:[%s2109_s26 + $0x78] sm:$0xf] }
  0x1e   : > { %v184_v16 = vld [vmem:[%s2109_s26 + $0x80] sm:$0xf]  ;;  %181 = vst [vmem:[%s2113_s27 + $0x38] sm:$0xf] %v180_v14  ;;  %183 = vst [vmem:[%s2113_s27 + $0x3c] sm:$0xf] %v182_v15 }
  0x1f   : > { %185 = vst [vmem:[%s2113_s27 + $0x40] sm:$0xf] %v184_v16  ;;  %v186_v17 = vld [vmem:[%s2109_s26 + $0x88] sm:$0xf]  ;;  %v188_v18 = vld [vmem:[%s2109_s26 + $0x90] sm:$0xf] }
  0x20   : > { %v190_v19 = vld [vmem:[%s2109_s26 + $0x98] sm:$0xf]  ;;  %187 = vst [vmem:[%s2113_s27 + $0x44] sm:$0xf] %v186_v17  ;;  %189 = vst [vmem:[%s2113_s27 + $0x48] sm:$0xf] %v188_v18 }
  0x21   : > { %191 = vst [vmem:[%s2113_s27 + $0x4c] sm:$0xf] %v190_v19  ;;  %v192_v20 = vld [vmem:[%s2109_s26 + $0xa0] sm:$0xf]  ;;  %v194_v21 = vld [vmem:[%s2109_s26 + $0xa8] sm:$0xf] }
  0x22   : > { %v196_v22 = vld [vmem:[%s2109_s26 + $0xb0] sm:$0xf]  ;;  %193 = vst [vmem:[%s2113_s27 + $0x50] sm:$0xf] %v192_v20  ;;  %195 = vst [vmem:[%s2113_s27 + $0x54] sm:$0xf] %v194_v21 }
  0x23   : > { %197 = vst [vmem:[%s2113_s27 + $0x58] sm:$0xf] %v196_v22  ;;  %v198_v23 = vld [vmem:[%s2109_s26 + $0xb8] sm:$0xf]  ;;  %v200_v24 = vld [vmem:[%s2109_s26 + $0xc0] sm:$0xf] }
  0x24   : > { %v202_v25 = vld [vmem:[%s2109_s26 + $0xc8] sm:$0xf]  ;;  %199 = vst [vmem:[%s2113_s27 + $0x5c] sm:$0xf] %v198_v23  ;;  %201 = vst [vmem:[%s2113_s27 + $0x60] sm:$0xf] %v200_v24 }
  0x25   : > { %203 = vst [vmem:[%s2113_s27 + $0x64] sm:$0xf] %v202_v25  ;;  %v204_v26 = vld [vmem:[%s2109_s26 + $0xd0] sm:$0xf]  ;;  %v206_v27 = vld [vmem:[%s2109_s26 + $0xd8] sm:$0xf] }
  0x26   : > { %v208_v28 = vld [vmem:[%s2109_s26 + $0xe0] sm:$0xf]  ;;  %205 = vst [vmem:[%s2113_s27 + $0x68] sm:$0xf] %v204_v26  ;;  %207 = vst [vmem:[%s2113_s27 + $0x6c] sm:$0xf] %v206_v27 }
  0x27   : > { %209 = vst [vmem:[%s2113_s27 + $0x70] sm:$0xf] %v208_v28  ;;  %v210_v29 = vld [vmem:[%s2109_s26 + $0xe8] sm:$0xf]  ;;  %v212_v30 = vld [vmem:[%s2109_s26 + $0xf0] sm:$0xf] }
  0x28   : > { %v214_v31 = vld [vmem:[%s2109_s26 + $0xf8] sm:$0xf]  ;;  %211 = vst [vmem:[%s2113_s27 + $0x74] sm:$0xf] %v210_v29  ;;  %213 = vst [vmem:[%s2113_s27 + $0x78] sm:$0xf] %v212_v30 }
  0x29   : > { %215 = vst [vmem:[%s2113_s27 + $0x7c] sm:$0xf] %v214_v31  ;;  %v216_v32 = vld [vmem:[%s2109_s26 + $0x100] sm:$0xf]  ;;  %v218_v33 = vld [vmem:[%s2109_s26 + $0x108] sm:$0xf] }
  0x2a   : > { %v220_v34 = vld [vmem:[%s2109_s26 + $0x110] sm:$0xf]  ;;  %217 = vst [vmem:[%s2113_s27 + $0x80] sm:$0xf] %v216_v32  ;;  %219 = vst [vmem:[%s2113_s27 + $0x84] sm:$0xf] %v218_v33 }
  0x2b   : > { %221 = vst [vmem:[%s2113_s27 + $0x88] sm:$0xf] %v220_v34  ;;  %v222_v35 = vld [vmem:[%s2109_s26 + $0x118] sm:$0xf]  ;;  %v224_v36 = vld [vmem:[%s2109_s26 + $0x120] sm:$0xf] }
  0x2c   : > { %v226_v37 = vld [vmem:[%s2109_s26 + $0x128] sm:$0xf]  ;;  %223 = vst [vmem:[%s2113_s27 + $0x8c] sm:$0xf] %v222_v35  ;;  %225 = vst [vmem:[%s2113_s27 + $0x90] sm:$0xf] %v224_v36 }
  0x2d   : > { %227 = vst [vmem:[%s2113_s27 + $0x94] sm:$0xf] %v226_v37  ;;  %v228_v38 = vld [vmem:[%s2109_s26 + $0x130] sm:$0xf]  ;;  %v230_v39 = vld [vmem:[%s2109_s26 + $0x138] sm:$0xf] }
  0x2e   : > { %v232_v40 = vld [vmem:[%s2109_s26 + $0x140] sm:$0xf]  ;;  %229 = vst [vmem:[%s2113_s27 + $0x98] sm:$0xf] %v228_v38  ;;  %231 = vst [vmem:[%s2113_s27 + $0x9c] sm:$0xf] %v230_v39 }
  0x2f   : > { %233 = vst [vmem:[%s2113_s27 + $0xa0] sm:$0xf] %v232_v40  ;;  %v234_v41 = vld [vmem:[%s2109_s26 + $0x148] sm:$0xf]  ;;  %v236_v42 = vld [vmem:[%s2109_s26 + $0x150] sm:$0xf] }
  0x30   : > { %v238_v43 = vld [vmem:[%s2109_s26 + $0x158] sm:$0xf]  ;;  %235 = vst [vmem:[%s2113_s27 + $0xa4] sm:$0xf] %v234_v41  ;;  %237 = vst [vmem:[%s2113_s27 + $0xa8] sm:$0xf] %v236_v42 }
  0x31   : > { %239 = vst [vmem:[%s2113_s27 + $0xac] sm:$0xf] %v238_v43  ;;  %v240_v44 = vld [vmem:[%s2109_s26 + $0x160] sm:$0xf]  ;;  %v242_v45 = vld [vmem:[%s2109_s26 + $0x168] sm:$0xf] }
  0x32   : > { %v244_v46 = vld [vmem:[%s2109_s26 + $0x170] sm:$0xf]  ;;  %241 = vst [vmem:[%s2113_s27 + $0xb0] sm:$0xf] %v240_v44  ;;  %243 = vst [vmem:[%s2113_s27 + $0xb4] sm:$0xf] %v242_v45 }
  0x33   : > { %245 = vst [vmem:[%s2113_s27 + $0xb8] sm:$0xf] %v244_v46  ;;  %v246_v47 = vld [vmem:[%s2109_s26 + $0x178] sm:$0xf]  ;;  %v248_v48 = vld [vmem:[%s2109_s26 + $0x180] sm:$0xf] }
  0x34   : > { %v250_v49 = vld [vmem:[%s2109_s26 + $0x188] sm:$0xf]  ;;  %247 = vst [vmem:[%s2113_s27 + $0xbc] sm:$0xf] %v246_v47  ;;  %249 = vst [vmem:[%s2113_s27 + $0xc0] sm:$0xf] %v248_v48 }
  0x35   : > { %251 = vst [vmem:[%s2113_s27 + $0xc4] sm:$0xf] %v250_v49  ;;  %v252_v50 = vld [vmem:[%s2109_s26 + $0x190] sm:$0xf]  ;;  %v254_v51 = vld [vmem:[%s2109_s26 + $0x198] sm:$0xf] }
  0x36   : > { %v256_v52 = vld [vmem:[%s2109_s26 + $0x1a0] sm:$0xf]  ;;  %253 = vst [vmem:[%s2113_s27 + $0xc8] sm:$0xf] %v252_v50  ;;  %255 = vst [vmem:[%s2113_s27 + $0xcc] sm:$0xf] %v254_v51 }
  0x37   : > { %257 = vst [vmem:[%s2113_s27 + $0xd0] sm:$0xf] %v256_v52  ;;  %v258_v53 = vld [vmem:[%s2109_s26 + $0x1a8] sm:$0xf]  ;;  %v260_v54 = vld [vmem:[%s2109_s26 + $0x1b0] sm:$0xf] }
  0x38   : > { %v262_v55 = vld [vmem:[%s2109_s26 + $0x1b8] sm:$0xf]  ;;  %259 = vst [vmem:[%s2113_s27 + $0xd4] sm:$0xf] %v258_v53  ;;  %261 = vst [vmem:[%s2113_s27 + $0xd8] sm:$0xf] %v260_v54 }
  0x39   : > { %263 = vst [vmem:[%s2113_s27 + $0xdc] sm:$0xf] %v262_v55  ;;  %v264_v56 = vld [vmem:[%s2109_s26 + $0x1c0] sm:$0xf]  ;;  %v266_v57 = vld [vmem:[%s2109_s26 + $0x1c8] sm:$0xf] }
  0x3a   : > { %v268_v58 = vld [vmem:[%s2109_s26 + $0x1d0] sm:$0xf]  ;;  %265 = vst [vmem:[%s2113_s27 + $0xe0] sm:$0xf] %v264_v56  ;;  %267 = vst [vmem:[%s2113_s27 + $0xe4] sm:$0xf] %v266_v57 }
  0x3b   : > { %269 = vst [vmem:[%s2113_s27 + $0xe8] sm:$0xf] %v268_v58  ;;  %v270_v59 = vld [vmem:[%s2109_s26 + $0x1d8] sm:$0xf]  ;;  %v272_v60 = vld [vmem:[%s2109_s26 + $0x1e0] sm:$0xf] }
  0x3c   : > { %v274_v61 = vld [vmem:[%s2109_s26 + $0x1e8] sm:$0xf]  ;;  %271 = vst [vmem:[%s2113_s27 + $0xec] sm:$0xf] %v270_v59  ;;  %273 = vst [vmem:[%s2113_s27 + $0xf0] sm:$0xf] %v272_v60 }
  0x3d   : > { %275 = vst [vmem:[%s2113_s27 + $0xf4] sm:$0xf] %v274_v61  ;;  %v276_v62 = vld [vmem:[%s2109_s26 + $0x1f0] sm:$0xf]  ;;  %v278_v63 = vld [vmem:[%s2109_s26 + $0x1f8] sm:$0xf] }
  0x3e   : > { %v280_v0 = vld [vmem:[%s2109_s26 + $0x200] sm:$0xf]  ;;  %277 = vst [vmem:[%s2113_s27 + $0xf8] sm:$0xf] %v276_v62  ;;  %279 = vst [vmem:[%s2113_s27 + $0xfc] sm:$0xf] %v278_v63 }
  0x3f   : > { %281 = vst [vmem:[%s2113_s27 + $0x100] sm:$0xf] %v280_v0  ;;  %v282_v1 = vld [vmem:[%s2109_s26 + $0x208] sm:$0xf]  ;;  %v284_v2 = vld [vmem:[%s2109_s26 + $0x210] sm:$0xf] }
  0x40   : > { %v286_v3 = vld [vmem:[%s2109_s26 + $0x218] sm:$0xf]  ;;  %283 = vst [vmem:[%s2113_s27 + $0x104] sm:$0xf] %v282_v1  ;;  %285 = vst [vmem:[%s2113_s27 + $0x108] sm:$0xf] %v284_v2 }
  0x41   : > { %287 = vst [vmem:[%s2113_s27 + $0x10c] sm:$0xf] %v286_v3  ;;  %v288_v4 = vld [vmem:[%s2109_s26 + $0x220] sm:$0xf]  ;;  %v290_v5 = vld [vmem:[%s2109_s26 + $0x228] sm:$0xf] }
  0x42   : > { %v292_v6 = vld [vmem:[%s2109_s26 + $0x230] sm:$0xf]  ;;  %289 = vst [vmem:[%s2113_s27 + $0x110] sm:$0xf] %v288_v4  ;;  %291 = vst [vmem:[%s2113_s27 + $0x114] sm:$0xf] %v290_v5 }
  0x43   : > { %293 = vst [vmem:[%s2113_s27 + $0x118] sm:$0xf] %v292_v6  ;;  %v294_v7 = vld [vmem:[%s2109_s26 + $0x238] sm:$0xf]  ;;  %v296_v8 = vld [vmem:[%s2109_s26 + $0x240] sm:$0xf] }
  0x44   : > { %v298_v9 = vld [vmem:[%s2109_s26 + $0x248] sm:$0xf]  ;;  %295 = vst [vmem:[%s2113_s27 + $0x11c] sm:$0xf] %v294_v7  ;;  %297 = vst [vmem:[%s2113_s27 + $0x120] sm:$0xf] %v296_v8 }
  0x45   : > { %299 = vst [vmem:[%s2113_s27 + $0x124] sm:$0xf] %v298_v9  ;;  %v300_v10 = vld [vmem:[%s2109_s26 + $0x250] sm:$0xf]  ;;  %v302_v11 = vld [vmem:[%s2109_s26 + $0x258] sm:$0xf] }
  0x46   : > { %v304_v12 = vld [vmem:[%s2109_s26 + $0x260] sm:$0xf]  ;;  %301 = vst [vmem:[%s2113_s27 + $0x128] sm:$0xf] %v300_v10  ;;  %303 = vst [vmem:[%s2113_s27 + $0x12c] sm:$0xf] %v302_v11 }
  0x47   : > { %305 = vst [vmem:[%s2113_s27 + $0x130] sm:$0xf] %v304_v12  ;;  %v306_v13 = vld [vmem:[%s2109_s26 + $0x268] sm:$0xf]  ;;  %v308_v14 = vld [vmem:[%s2109_s26 + $0x270] sm:$0xf] }
  0x48   : > { %v310_v15 = vld [vmem:[%s2109_s26 + $0x278] sm:$0xf]  ;;  %307 = vst [vmem:[%s2113_s27 + $0x134] sm:$0xf] %v306_v13  ;;  %309 = vst [vmem:[%s2113_s27 + $0x138] sm:$0xf] %v308_v14 }
  0x49   : > { %311 = vst [vmem:[%s2113_s27 + $0x13c] sm:$0xf] %v310_v15  ;;  %v312_v16 = vld [vmem:[%s2109_s26 + $0x280] sm:$0xf]  ;;  %v314_v17 = vld [vmem:[%s2109_s26 + $0x288] sm:$0xf] }
  0x4a   : > { %v316_v18 = vld [vmem:[%s2109_s26 + $0x290] sm:$0xf]  ;;  %313 = vst [vmem:[%s2113_s27 + $0x140] sm:$0xf] %v312_v16  ;;  %315 = vst [vmem:[%s2113_s27 + $0x144] sm:$0xf] %v314_v17 }
  0x4b   : > { %317 = vst [vmem:[%s2113_s27 + $0x148] sm:$0xf] %v316_v18  ;;  %v318_v19 = vld [vmem:[%s2109_s26 + $0x298] sm:$0xf]  ;;  %v320_v20 = vld [vmem:[%s2109_s26 + $0x2a0] sm:$0xf] }
  0x4c   : > { %v322_v21 = vld [vmem:[%s2109_s26 + $0x2a8] sm:$0xf]  ;;  %319 = vst [vmem:[%s2113_s27 + $0x14c] sm:$0xf] %v318_v19  ;;  %321 = vst [vmem:[%s2113_s27 + $0x150] sm:$0xf] %v320_v20 }
  0x4d   : > { %323 = vst [vmem:[%s2113_s27 + $0x154] sm:$0xf] %v322_v21  ;;  %v324_v22 = vld [vmem:[%s2109_s26 + $0x2b0] sm:$0xf]  ;;  %v326_v23 = vld [vmem:[%s2109_s26 + $0x2b8] sm:$0xf] }
  0x4e   : > { %v328_v24 = vld [vmem:[%s2109_s26 + $0x2c0] sm:$0xf]  ;;  %325 = vst [vmem:[%s2113_s27 + $0x158] sm:$0xf] %v324_v22  ;;  %327 = vst [vmem:[%s2113_s27 + $0x15c] sm:$0xf] %v326_v23 }
  0x4f   : > { %329 = vst [vmem:[%s2113_s27 + $0x160] sm:$0xf] %v328_v24  ;;  %v330_v25 = vld [vmem:[%s2109_s26 + $0x2c8] sm:$0xf]  ;;  %v332_v26 = vld [vmem:[%s2109_s26 + $0x2d0] sm:$0xf] }
  0x50   : > { %v334_v27 = vld [vmem:[%s2109_s26 + $0x2d8] sm:$0xf]  ;;  %331 = vst [vmem:[%s2113_s27 + $0x164] sm:$0xf] %v330_v25  ;;  %333 = vst [vmem:[%s2113_s27 + $0x168] sm:$0xf] %v332_v26 }
  0x51   : > { %335 = vst [vmem:[%s2113_s27 + $0x16c] sm:$0xf] %v334_v27  ;;  %v336_v28 = vld [vmem:[%s2109_s26 + $0x2e0] sm:$0xf]  ;;  %v338_v29 = vld [vmem:[%s2109_s26 + $0x2e8] sm:$0xf] }
  0x52   : > { %v340_v30 = vld [vmem:[%s2109_s26 + $0x2f0] sm:$0xf]  ;;  %337 = vst [vmem:[%s2113_s27 + $0x170] sm:$0xf] %v336_v28  ;;  %339 = vst [vmem:[%s2113_s27 + $0x174] sm:$0xf] %v338_v29 }
  0x53   : > { %341 = vst [vmem:[%s2113_s27 + $0x178] sm:$0xf] %v340_v30  ;;  %v342_v31 = vld [vmem:[%s2109_s26 + $0x2f8] sm:$0xf]  ;;  %v344_v32 = vld [vmem:[%s2109_s26 + $0x300] sm:$0xf] }
  0x54   : > { %v346_v33 = vld [vmem:[%s2109_s26 + $0x308] sm:$0xf]  ;;  %343 = vst [vmem:[%s2113_s27 + $0x17c] sm:$0xf] %v342_v31  ;;  %345 = vst [vmem:[%s2113_s27 + $0x180] sm:$0xf] %v344_v32 }
  0x55   : > { %347 = vst [vmem:[%s2113_s27 + $0x184] sm:$0xf] %v346_v33  ;;  %v348_v34 = vld [vmem:[%s2109_s26 + $0x310] sm:$0xf]  ;;  %v350_v35 = vld [vmem:[%s2109_s26 + $0x318] sm:$0xf] }
  0x56   : > { %v352_v36 = vld [vmem:[%s2109_s26 + $0x320] sm:$0xf]  ;;  %349 = vst [vmem:[%s2113_s27 + $0x188] sm:$0xf] %v348_v34  ;;  %351 = vst [vmem:[%s2113_s27 + $0x18c] sm:$0xf] %v350_v35 }
  0x57   : > { %353 = vst [vmem:[%s2113_s27 + $0x190] sm:$0xf] %v352_v36  ;;  %v354_v37 = vld [vmem:[%s2109_s26 + $0x328] sm:$0xf]  ;;  %v356_v38 = vld [vmem:[%s2109_s26 + $0x330] sm:$0xf] }
  0x58   : > { %v358_v39 = vld [vmem:[%s2109_s26 + $0x338] sm:$0xf]  ;;  %355 = vst [vmem:[%s2113_s27 + $0x194] sm:$0xf] %v354_v37  ;;  %357 = vst [vmem:[%s2113_s27 + $0x198] sm:$0xf] %v356_v38 }
  0x59   : > { %359 = vst [vmem:[%s2113_s27 + $0x19c] sm:$0xf] %v358_v39  ;;  %v360_v40 = vld [vmem:[%s2109_s26 + $0x340] sm:$0xf]  ;;  %v362_v41 = vld [vmem:[%s2109_s26 + $0x348] sm:$0xf] }
  0x5a   : > { %v364_v42 = vld [vmem:[%s2109_s26 + $0x350] sm:$0xf]  ;;  %361 = vst [vmem:[%s2113_s27 + $0x1a0] sm:$0xf] %v360_v40  ;;  %363 = vst [vmem:[%s2113_s27 + $0x1a4] sm:$0xf] %v362_v41 }
  0x5b   : > { %365 = vst [vmem:[%s2113_s27 + $0x1a8] sm:$0xf] %v364_v42  ;;  %v366_v43 = vld [vmem:[%s2109_s26 + $0x358] sm:$0xf]  ;;  %v368_v44 = vld [vmem:[%s2109_s26 + $0x360] sm:$0xf] }
  0x5c   : > { %v370_v45 = vld [vmem:[%s2109_s26 + $0x368] sm:$0xf]  ;;  %367 = vst [vmem:[%s2113_s27 + $0x1ac] sm:$0xf] %v366_v43  ;;  %369 = vst [vmem:[%s2113_s27 + $0x1b0] sm:$0xf] %v368_v44 }
  0x5d   : > { %371 = vst [vmem:[%s2113_s27 + $0x1b4] sm:$0xf] %v370_v45  ;;  %v372_v46 = vld [vmem:[%s2109_s26 + $0x370] sm:$0xf]  ;;  %v374_v47 = vld [vmem:[%s2109_s26 + $0x378] sm:$0xf] }
  0x5e   : > { %v376_v48 = vld [vmem:[%s2109_s26 + $0x380] sm:$0xf]  ;;  %373 = vst [vmem:[%s2113_s27 + $0x1b8] sm:$0xf] %v372_v46  ;;  %375 = vst [vmem:[%s2113_s27 + $0x1bc] sm:$0xf] %v374_v47 }
  0x5f   : > { %377 = vst [vmem:[%s2113_s27 + $0x1c0] sm:$0xf] %v376_v48  ;;  %v378_v49 = vld [vmem:[%s2109_s26 + $0x388] sm:$0xf]  ;;  %v380_v50 = vld [vmem:[%s2109_s26 + $0x390] sm:$0xf] }
  0x60   : > { %v382_v51 = vld [vmem:[%s2109_s26 + $0x398] sm:$0xf]  ;;  %379 = vst [vmem:[%s2113_s27 + $0x1c4] sm:$0xf] %v378_v49  ;;  %381 = vst [vmem:[%s2113_s27 + $0x1c8] sm:$0xf] %v380_v50 }
  0x61   : > { %383 = vst [vmem:[%s2113_s27 + $0x1cc] sm:$0xf] %v382_v51  ;;  %v384_v52 = vld [vmem:[%s2109_s26 + $0x3a0] sm:$0xf]  ;;  %v386_v53 = vld [vmem:[%s2109_s26 + $0x3a8] sm:$0xf] }
  0x62   : > { %v388_v54 = vld [vmem:[%s2109_s26 + $0x3b0] sm:$0xf]  ;;  %385 = vst [vmem:[%s2113_s27 + $0x1d0] sm:$0xf] %v384_v52  ;;  %387 = vst [vmem:[%s2113_s27 + $0x1d4] sm:$0xf] %v386_v53 }
  0x63   : > { %389 = vst [vmem:[%s2113_s27 + $0x1d8] sm:$0xf] %v388_v54  ;;  %v390_v55 = vld [vmem:[%s2109_s26 + $0x3b8] sm:$0xf]  ;;  %v392_v56 = vld [vmem:[%s2109_s26 + $0x3c0] sm:$0xf] }
  0x64   : > { %v394_v57 = vld [vmem:[%s2109_s26 + $0x3c8] sm:$0xf]  ;;  %391 = vst [vmem:[%s2113_s27 + $0x1dc] sm:$0xf] %v390_v55  ;;  %393 = vst [vmem:[%s2113_s27 + $0x1e0] sm:$0xf] %v392_v56 }
  0x65   : > { %395 = vst [vmem:[%s2113_s27 + $0x1e4] sm:$0xf] %v394_v57  ;;  %v396_v58 = vld [vmem:[%s2109_s26 + $0x3d0] sm:$0xf]  ;;  %v398_v59 = vld [vmem:[%s2109_s26 + $0x3d8] sm:$0xf] }
  0x66   : > { %v400_v60 = vld [vmem:[%s2109_s26 + $0x3e0] sm:$0xf]  ;;  %397 = vst [vmem:[%s2113_s27 + $0x1e8] sm:$0xf] %v396_v58  ;;  %399 = vst [vmem:[%s2113_s27 + $0x1ec] sm:$0xf] %v398_v59 }
  0x67   : > { %401 = vst [vmem:[%s2113_s27 + $0x1f0] sm:$0xf] %v400_v60  ;;  %v402_v61 = vld [vmem:[%s2109_s26 + $0x3e8] sm:$0xf]  ;;  %v404_v62 = vld [vmem:[%s2109_s26 + $0x3f0] sm:$0xf] }
  0x68   : > { %v406_v63 = vld [vmem:[%s2109_s26 + $0x3f8] sm:$0xf]  ;;  %403 = vst [vmem:[%s2113_s27 + $0x1f4] sm:$0xf] %v402_v61  ;;  %405 = vst [vmem:[%s2113_s27 + $0x1f8] sm:$0xf] %v404_v62 }
  0x69   : > { %407 = vst [vmem:[%s2113_s27 + $0x1fc] sm:$0xf] %v406_v63 }
  0x6a PF: > { %p1623_p7 = scmp.ge.s32.totalorder %s2046_s14, 1  ;;  %p685_p8 = scmp.lt.s32.totalorder %s2046_s14, 3 }
  0x6c   : > { %p686_p9 = pnand %p1623_p7, %p685_p8 }
  0x6d   : > { %s692_s28 = sand.u32 (!%p686_p9), 1, %s2038_s12   ;;  %v2375_v0 = vld [vmem:[%s2508_s1 + $0x4] ss:$8 sps:$4 sm:$0xff] (!%p686_p9)   ;;  %vm860_vm0 = vcmask (!%p686_p9), 998400   ;;  %v1467_v2 = vld [vmem:[%s2509_s2 + $0x10] sm:$0xf] (!%p686_p9) }
  0x6e   : > { %689 = sbr.rel (%p686_p9) target bundleno = 420 (0x1a4), region = 69  ;;  %s1624_s4 = sshll.u32 (!%p686_p9), %s692_s28, 9  ;;  %1645 = vmatprep.mubr.msk.bf16.mxu0 (!%p686_p9), %vm860_vm0, %v2375_v0  ;;  %1695 = vmatprep.mubr.msk.bf16.mxu1 (!%p686_p9), %vm860_vm0, %v2375_v0  ;;  %v1465_v1 = vld [vmem:[%s2509_s2] sm:$0xff] (!%p686_p9)  ;;  %v2048_v4 = vmov (!%p686_p9), 0   ;;  %v1466_v5 = vld [vmem:[%s2509_s2 + $0x8] sm:$0xff] (!%p686_p9)  ;;  %vm867_vm1 = vcmask (!%p686_p9), 1044480  }
  0x6f   : > { %s2389_s9 = scalar_lea.vmem (!%p686_p9), [#allocation2], %s1624_s4  ;;  %1953 = vset.pattern.permute.xlu0 (!%p686_p9), %v2048_v4  ;;  %1954 = vset.pattern.permute.xlu1 (!%p686_p9), %v2048_v4  ;;  %v717_v34 = vld [vmem:[%s2508_s1 + $0x10] sm:$0x33] (!%p686_p9)  ;;  %v2430_v36 = vld [vmem:[%s2508_s1] ss:$8 sps:$4 sm:$0xff] (!%p686_p9)   ;;  %s1927_s23 = smul.u32 (!%p686_p9), 12, %s692_s28 }
  0x70   : > { %v1955_v3 = vld [vmem:[%s2389_s9 + $0x40] sm:$0xff] (!%p686_p9)   ;;  %1470 = vperm.xlu0 (!%p686_p9), %1953, %v1465_v1   ;;  %1480 = vperm.xlu1 (!%p686_p9), %1954, %v1467_v2   ;;  %v1959_v9 = vld [vmem:[%s2389_s9 + $0x48] sm:$0xff] (!%p686_p9)   ;;  %v1963_v13 = vld [vmem:[%s2389_s9 + $0x50] sm:$0xff] (!%p686_p9)   ;;  %v2438_v41 = vcombine.high (!%p686_p9), %v717_v34, %v717_v34  ;;  %v1627_v48 = vcombine.low (!%p686_p9), %v717_v34, %v717_v34 }
  0x71   : > { %v1956_v6 = vld [vmem:[%s2389_s9 + $0xc0] sm:$0xff] (!%p686_p9)   ;;  %1811 = vmatprep.subr.bf16.mxu0 (!%p686_p9), %v1955_v3  ;;  %v1960_v10 = vld [vmem:[%s2389_s9 + $0xc8] sm:$0xff] (!%p686_p9)   ;;  %v1964_v14 = vld [vmem:[%s2389_s9 + $0xd0] sm:$0xff] (!%p686_p9)   ;;  %s713_s24 = scalar_lea.vmem (!%p686_p9), [#allocation3], %s1927_s23 }
  0x72   : > { %v1957_v7 = vld [vmem:[%s2389_s9] sm:$0xff] (!%p686_p9)   ;;  %1839 = vmatprep.subr.bf16.mxu1 (!%p686_p9), %v1956_v6  ;;  %v1961_v11 = vld [vmem:[%s2389_s9 + $0x8] sm:$0xff] (!%p686_p9)   ;;  %v1965_v15 = vld [vmem:[%s2389_s9 + $0x10] sm:$0xff] (!%p686_p9)  }
  0x73   : > { %v1958_v8 = vld [vmem:[%s2389_s9 + $0x80] sm:$0xff] (!%p686_p9)   ;;  %1812 = vmatpush3.bf16.msra.mxu0 (!%p686_p9), %v1957_v7  ;;  %v1962_v12 = vld [vmem:[%s2389_s9 + $0x88] sm:$0xff] (!%p686_p9)   ;;  %v1966_v16 = vld [vmem:[%s2389_s9 + $0x90] sm:$0xff] (!%p686_p9)  }
  0x74   : > { %1840 = vmatpush3.bf16.msra.mxu1 (!%p686_p9), %v1958_v8  ;;  %1475 = vperm.xlu0 (!%p686_p9), %1953, %v1466_v5   ;;  %v1967_v17 = vld [vmem:[%s2389_s9 + $0x58] sm:$0xff] (!%p686_p9)   ;;  %v1971_v21 = vld [vmem:[%s2389_s9 + $0x60] sm:$0xff] (!%p686_p9)   ;;  %v1975_v25 = vld [vmem:[%s2389_s9 + $0x68] sm:$0xff] (!%p686_p9)  }
  0x75   : > { %1813 = vmatprep.subr.bf16.mxu0 %v1959_v9  ;;  %1841 = vmatprep.subr.bf16.mxu1 %v1960_v10  ;;  %v1968_v18 = vld [vmem:[%s2389_s9 + $0xd8] sm:$0xff]   ;;  %v1972_v22 = vld [vmem:[%s2389_s9 + $0xe0] sm:$0xff]   ;;  %v1976_v26 = vld [vmem:[%s2389_s9 + $0xe8] sm:$0xff]   ;;  %s1800_s12 = sshll.u32 (%p2099_p5), %s1617_s15, 2 }
  0x76   : > { %v1969_v19 = vld [vmem:[%s2389_s9 + $0x18] sm:$0xff]   ;;  %v1973_v23 = vld [vmem:[%s2389_s9 + $0x20] sm:$0xff]   ;;  %v1977_v27 = vld [vmem:[%s2389_s9 + $0x28] sm:$0xff]   ;;  %s1513_s27 = scalar_lea.vmem (%p2099_p5), %s2510_s3, %s1800_s12 }
  0x77   : > { %1814 = vmatpush3.bf16.msra.mxu0 %v1961_v11  ;;  %v1970_v20 = vld [vmem:[%s2389_s9 + $0x98] sm:$0xff]   ;;  %v1974_v24 = vld [vmem:[%s2389_s9 + $0xa0] sm:$0xff]   ;;  %v1978_v28 = vld [vmem:[%s2389_s9 + $0xa8] sm:$0xff]  }
  0x78   : > { %1842 = vmatpush3.bf16.msra.mxu1 %v1962_v12  ;;  %1815 = vmatprep.subr.bf16.mxu0 %v1963_v13  ;;  %v1979_v29 = vld [vmem:[%s2389_s9 + $0x70] sm:$0xff]   ;;  %v1983_v33 = vld [vmem:[%s2389_s9 + $0x78] sm:$0x1f]   ;;  %v1990_v39 = vld [vmem:[%s2389_s9 + $0x140] sm:$0xff]  }
  0x79   : > { %1843 = vmatprep.subr.bf16.mxu1 %v1964_v14  ;;  %v1980_v30 = vld [vmem:[%s2389_s9 + $0xf0] sm:$0xff]   ;;  %v1984_v35 = vld [vmem:[%s2389_s9 + $0xf8] sm:$0x1f]   ;;  %v1991_v40 = vld [vmem:[%s2389_s9 + $0x1c0] sm:$0xff]  }
  0x7a   : > { %v1981_v31 = vld [vmem:[%s2389_s9 + $0x30] sm:$0xff]   ;;  %v1985_v37 = vld [vmem:[%s2389_s9 + $0x38] sm:$0xff]   ;;  %v1992_v42 = vld [vmem:[%s2389_s9 + $0x100] sm:$0xff]  }
  0x7b   : > { %1816 = vmatpush3.bf16.msra.mxu0 %v1965_v15  ;;  %v1982_v32 = vld [vmem:[%s2389_s9 + $0xb0] sm:$0xff]   ;;  %v1986_v38 = vld [vmem:[%s2389_s9 + $0xb8] sm:$0xff]   ;;  %v1993_v43 = vld [vmem:[%s2389_s9 + $0x180] sm:$0xff]  }
  0x7c   : > { %1844 = vmatpush3.bf16.msra.mxu1 %v1966_v16  ;;  %1817 = vmatprep.subr.bf16.mxu0 %v1967_v17  ;;  %v1994_v44 = vld [vmem:[%s2389_s9 + $0x148] sm:$0xff]   ;;  %v1998_v49 = vld [vmem:[%s2389_s9 + $0x150] sm:$0xff]   ;;  %v2002_v53 = vld [vmem:[%s2389_s9 + $0x158] sm:$0xff]  }
  0x7d   : > { %1845 = vmatprep.subr.bf16.mxu1 %v1968_v18  ;;  %v1995_v45 = vld [vmem:[%s2389_s9 + $0x1c8] sm:$0xff]   ;;  %v1999_v50 = vld [vmem:[%s2389_s9 + $0x1d0] sm:$0xff]   ;;  %v2003_v54 = vld [vmem:[%s2389_s9 + $0x1d8] sm:$0xff]  }
  0x7e   : > { %v1996_v46 = vld [vmem:[%s2389_s9 + $0x108] sm:$0xff]   ;;  %v2000_v51 = vld [vmem:[%s2389_s9 + $0x110] sm:$0xff]   ;;  %v2004_v55 = vld [vmem:[%s2389_s9 + $0x118] sm:$0xff]  }
  0x7f   : > { %1818 = vmatpush3.bf16.msra.mxu0 %v1969_v19  ;;  %v1997_v47 = vld [vmem:[%s2389_s9 + $0x188] sm:$0xff]   ;;  %v2001_v52 = vld [vmem:[%s2389_s9 + $0x190] sm:$0xff]   ;;  %v2005_v56 = vld [vmem:[%s2389_s9 + $0x198] sm:$0xff]  }
  0x80   : > { %1846 = vmatpush3.bf16.msra.mxu1 %v1970_v20  ;;  %1819 = vmatprep.subr.bf16.mxu0 %v1971_v21  ;;  %v2006_v57 = vld [vmem:[%s2389_s9 + $0x160] sm:$0xff]   ;;  %v2011_v61 = vld [vmem:[%s2389_s9 + $0x168] sm:$0xff]   ;;  %v2016_v1 = vld [vmem:[%s2389_s9 + $0x170] sm:$0xff]  }
  0x81   : > { %1847 = vmatprep.subr.bf16.mxu1 %v1972_v22  ;;  %v2007_v58 = vld [vmem:[%s2389_s9 + $0x1e0] sm:$0xff]   ;;  %v2012_v62 = vld [vmem:[%s2389_s9 + $0x1e8] sm:$0xff]   ;;  %v2017_v2 = vld [vmem:[%s2389_s9 + $0x1f0] sm:$0xff]  }
  0x82   : > { %v2008_v59 = vld [vmem:[%s2389_s9 + $0x120] sm:$0xff]   ;;  %v2014_v63 = vld [vmem:[%s2389_s9 + $0x128] sm:$0xff]   ;;  %v2018_v3 = vld [vmem:[%s2389_s9 + $0x130] sm:$0xff]  }
  0x83   : > { %1820 = vmatpush3.bf16.msra.mxu0 %v1973_v23  ;;  %v2009_v60 = vld [vmem:[%s2389_s9 + $0x1a0] sm:$0xff]   ;;  %v2019_v4 = vld [vmem:[%s2389_s9 + $0x1b0] sm:$0xff]   ;;  %v2020_v5 = vld [vmem:[%s2389_s9 + $0x178] sm:$0x1f]  }
  0x84   : > { %1848 = vmatpush3.bf16.msra.mxu1 %v1974_v24  ;;  %1821 = vmatprep.subr.bf16.mxu0 %v1975_v25  ;;  %v2021_v6 = vld [vmem:[%s2389_s9 + $0x1f8] sm:$0x1f]  }
  0x85   : > { %1849 = vmatprep.subr.bf16.mxu1 %v1976_v26  ;;  %v2022_v7 = vld [vmem:[%s2389_s9 + $0x138] sm:$0xff]  }
  0x86   : > { %v2023_v8 = vld [vmem:[%s2389_s9 + $0x1b8] sm:$0xff]  }
  0x87   : > { %1822 = vmatpush3.bf16.msra.mxu0 %v1977_v27 }
  0x88   : > { %1850 = vmatpush3.bf16.msra.mxu1 %v1978_v28  ;;  %1823 = vmatprep.subr.bf16.mxu0 %v1979_v29 }
  0x89   : > { %1851 = vmatprep.subr.bf16.mxu1 %v1980_v30 }
  0x8b   : > { %1824 = vmatpush3.bf16.msra.mxu0 %v1981_v31 }
  0x8c   : > { %1852 = vmatpush3.bf16.msra.mxu1 %v1982_v32  ;;  %1923 = vmatprep.subr.msk.bf16.mxu0 %vm867_vm1, %v1983_v33 }
  0x8d   : > { %1924 = vmatprep.subr.msk.bf16.mxu1 %vm867_vm1, %v1984_v35 }
  0x8f   : > { %1826 = vmatpush3.bf16.msra.mxu0 %v1985_v37 }
  0x90   : > { %1854 = vmatpush3.bf16.msra.mxu1 %v1986_v38  ;;  %1867 = vmatprep.subr.bf16.mxu0 %v1990_v39 }
  0x91   : > { %1895 = vmatprep.subr.bf16.mxu1 %v1991_v40 }
  0x92   : > { %904 = vmatmul.mubr.bf16.vlgmr.msra.gmra.mrb[0].mxu0 %v2430_v36 }
  0x93   : > { %1083 = vmatmul.mubr.bf16.vlgmr.msra.gmra.mrb[0].mxu1 %v2430_v36  ;;  %1868 = vmatpush3.bf16.msra.mxu0 %v1992_v42 }
  0x94   : > { %1896 = vmatpush3.bf16.msra.mxu1 %v1993_v43  ;;  %1646 = vmatprep.mubr.msk.bf16.mxu0 %vm860_vm0, %v2438_v41 }
  0x95   : > { %1869 = vmatprep.subr.bf16.mxu0 %v1994_v44  ;;  %1696 = vmatprep.mubr.msk.bf16.mxu1 %vm860_vm0, %v2438_v41 }
  0x96   : > { %1897 = vmatprep.subr.bf16.mxu1 %v1995_v45 }
  0x97   : > { %1870 = vmatpush3.bf16.msra.mxu0 %v1996_v46 }
  0x98   : > { %1898 = vmatpush3.bf16.msra.mxu1 %v1997_v47  ;;  %1871 = vmatprep.subr.bf16.mxu0 %v1998_v49 }
  0x99   : > { %1899 = vmatprep.subr.bf16.mxu1 %v1999_v50 }
  0x9a   : > { %912 = vmatmul.mubr.bf16.gmra.mrb[4].mxu0 %v1627_v48 }
  0x9b   : > { %1872 = vmatpush3.bf16.msra.mxu0 %v2000_v51  ;;  %1091 = vmatmul.mubr.bf16.gmra.mrb[4].mxu1 %v1627_v48 }
  0x9c   : > { %1900 = vmatpush3.bf16.msra.mxu1 %v2001_v52  ;;  %1745 = vmatprep.mubr.msk.bf16.mxu0 %vm860_vm0, %v2375_v0 }
  0x9d   : > { %1873 = vmatprep.subr.bf16.mxu0 %v2002_v53  ;;  %1795 = vmatprep.mubr.msk.bf16.mxu1 %vm860_vm0, %v2375_v0  ;;  %v2015_v0 = vld [vmem:[%s2389_s9 + $0x1a8] sm:$0xff]  }
  0x9e   : > { %1901 = vmatprep.subr.bf16.mxu1 %v2003_v54 }
  0x9f   : > { %1874 = vmatpush3.bf16.msra.mxu0 %v2004_v55 }
  0xa0   : > { %1902 = vmatpush3.bf16.msra.mxu1 %v2005_v56  ;;  %1875 = vmatprep.subr.bf16.mxu0 %v2006_v57 }
  0xa1   : > { %1903 = vmatprep.subr.bf16.mxu1 %v2007_v58 }
  0xa3   : > { %1876 = vmatpush3.bf16.msra.mxu0 %v2008_v59 }
  0xa4   : > { %1904 = vmatpush3.bf16.msra.mxu1 %v2009_v60  ;;  %1877 = vmatprep.subr.bf16.mxu0 %v2011_v61 }
  0xa5   : > { %1905 = vmatprep.subr.bf16.mxu1 %v2012_v62 }
  0xa7   : > { %1878 = vmatpush3.bf16.msra.mxu0 %v2014_v63 }
  0xa8   : > { %1906 = vmatpush3.bf16.msra.mxu1 %v2015_v0  ;;  %1879 = vmatprep.subr.bf16.mxu0 %v2016_v1 }
  0xa9   : > { %1907 = vmatprep.subr.bf16.mxu1 %v2017_v2 }
  0xab   : > { %1880 = vmatpush3.bf16.msra.mxu0 %v2018_v3 }
  0xac   : > { %1908 = vmatpush3.bf16.msra.mxu1 %v2019_v4  ;;  %1925 = vmatprep.subr.msk.bf16.mxu0 %vm867_vm1, %v2020_v5 }
  0xad   : > { %1926 = vmatprep.subr.msk.bf16.mxu1 %vm867_vm1, %v2021_v6 }
  0xaf   : > { %1882 = vmatpush3.bf16.msra.mxu0 %v2022_v7 }
  0xb0   : > { %1910 = vmatpush3.bf16.msra.mxu1 %v2023_v8 }
  0xb2   : > { %1265 = vmatmul.mubr.bf16.vlgmr.msra.gmra.mrb[8].mxu0 %v2430_v36 }
  0xb3   : > { %1447 = vmatmul.mubr.bf16.vlgmr.msra.gmra.mrb[8].mxu1 %v2430_v36  ;;  %1746 = vmatprep.mubr.msk.bf16.mxu0 %vm860_vm0, %v2438_v41 }
  0xb4   : > { %1796 = vmatprep.mubr.msk.bf16.mxu1 %vm860_vm0, %v2438_v41 }
  0xba   : > { %1273 = vmatmul.mubr.bf16.gmra.mrb[12].mxu0 %v1627_v48 }
  0xbb   : > { %1455 = vmatmul.mubr.bf16.gmra.mrb[12].mxu1 %v1627_v48 }
  0xef   : > { %v1471_v35 = vpop.permute.xlu0 %1470  ;;  %v1481_v3 = vpop.permute.xlu1 %1480 }
  0xf3   : > { %v1476_v50 = vpop.permute.xlu0 %1475 }
 0x165   : > { %v1827_v9 = vpop.f32.mrb[0].mxu0 }
 0x166   : > { %v1855_v10 = vpop.f32.mrb[0].mxu1  ;;  %v1828_v11 = vpop.f32.mrb[1].mxu0 }
 0x167   : > { %v1829_v12 = vadd.f32 %v1828_v11, %v1827_v9  ;;  %v1856_v13 = vpop.f32.mrb[1].mxu1  ;;  %v1830_v14 = vpop.f32.mrb[2].mxu0 }
 0x168   : > { %v1857_v15 = vadd.f32 %v1856_v13, %v1855_v10  ;;  %v1858_v16 = vpop.f32.mrb[2].mxu1  ;;  %v1831_v17 = vpop.f32.mrb[3].mxu0 }
 0x169   : > { %v1832_v18 = vadd.f32 %v1831_v17, %v1830_v14  ;;  %v1859_v19 = vpop.f32.mrb[3].mxu1 }
 0x16a   : > { %v1098_v20 = vmax.f32 %v1829_v12, %v1857_v15  ;;  %v1860_v21 = vadd.f32 %v1859_v19, %v1858_v16 }
 0x16c   : > { %v1099_v22 = vmax.f32 %v1832_v18, %v1860_v21 }
 0x16d   : > { %v1833_v23 = vpop.f32.mrb[4].mxu0 }
 0x16e   : > { %v1834_v24 = vpop.f32.mrb[5].mxu0  ;;  %v1861_v25 = vpop.f32.mrb[4].mxu1 }
 0x16f   : > { %v1835_v26 = vadd.f32 %v1834_v24, %v1833_v23  ;;  %v1836_v27 = vpop.f32.mrb[6].mxu0  ;;  %v1862_v28 = vpop.f32.mrb[5].mxu1 }
 0x170   : > { %v1837_v29 = vpop.f32.mrb[7].mxu0  ;;  %v1863_v30 = vadd.f32 %v1862_v28, %v1861_v25  ;;  %v1864_v31 = vpop.f32.mrb[6].mxu1 }
 0x171   : > { %v1865_v32 = vpop.f32.mrb[7].mxu1 }
 0x172   : > { %v1100_v33 = vmax.f32 %v1835_v26, %v1863_v30 }
 0x185   : > { %v1883_v34 = vpop.f32.mrb[8].mxu0 }
 0x186   : > { %v1911_v36 = vpop.f32.mrb[8].mxu1  ;;  %v1884_v37 = vpop.f32.mrb[9].mxu0 }
 0x187   : > { %v1885_v38 = vadd.f32 %v1884_v37, %v1883_v34  ;;  %v1912_v39 = vpop.f32.mrb[9].mxu1  ;;  %v1886_v40 = vpop.f32.mrb[10].mxu0 }
 0x188   : > { %v1913_v41 = vadd.f32 %v1912_v39, %v1911_v36  ;;  %v1914_v42 = vpop.f32.mrb[10].mxu1  ;;  %v1887_v43 = vpop.f32.mrb[11].mxu0 }
 0x189   : > { %v1280_v44 = vmax.f32 %v1098_v20, %v1885_v38  ;;  %v1888_v45 = vadd.f32 %v1887_v43, %v1886_v40  ;;  %v1915_v46 = vpop.f32.mrb[11].mxu1 }
 0x18a   : > { %v1916_v47 = vadd.f32 %v1915_v46, %v1914_v42 }
 0x18b   : > { %v1281_v48 = vmax.f32 %v1099_v22, %v1888_v45  ;;  %v1462_v49 = vmax.f32 %v1280_v44, %v1913_v41 }
 0x18d   : > { %v1483_v51 = vadd.f32 %v1471_v35, %v1462_v49  ;;  %v1889_v52 = vpop.f32.mrb[12].mxu0  ;;  %v1463_v53 = vmax.f32 %v1281_v48, %v1916_v47 }
 0x18e   : > { %v1917_v54 = vpop.f32.mrb[12].mxu1  ;;  %v1890_v55 = vpop.f32.mrb[13].mxu0 }
 0x18f   : > { %v1484_v56 = vadd.f32 %v1476_v50, %v1463_v53  ;;  %v1891_v57 = vadd.f32 %v1890_v55, %v1889_v52  ;;  %v1918_v58 = vpop.f32.mrb[13].mxu1  ;;  %v1892_v59 = vpop.f32.mrb[14].mxu0  ;;  %v1486_v63 = vmax.f32 %v1483_v51, 0.0 }
 0x190   : > { %v1919_v60 = vadd.f32 %v1918_v58, %v1917_v54  ;;  %v1920_v61 = vpop.f32.mrb[14].mxu1  ;;  %v1893_v62 = vpop.f32.mrb[15].mxu0 }
 0x191   : > { %v1487_v0 = vmax.f32 %v1484_v56, 0.0  ;;  %v1282_v1 = vmax.f32 %v1100_v33, %v1891_v57  ;;  %v1921_v2 = vpop.f32.mrb[15].mxu1 }
 0x193   : > { %v1809_v4 = vpack.c.bf16 %v1487_v0, %v1486_v63  ;;  %v1464_v5 = vmax.f32 %v1282_v1, %v1919_v60 }
 0x195   : > { %v1485_v6 = vadd.f32 %v1481_v3, %v1464_v5  ;;  %1810 = vst [vmem:[%s713_s24] sm:$0xff] %v1809_v4   ;;  %1511 = sbr.rel (!%p2099_p5) target bundleno = 420 (0x1a4), region = 77 }
 0x197   : > { %v1488_v7 = vmax.f32 %v1485_v6, 0.0 }
 0x199   : > { %v1805_v8 = vpack.c.bf16 %v1488_v7, %v1488_v7 }
 0x19b   : > { %1504 = vst [vmem:[%s713_s24 + $0x8] sm:$0x3] %v1805_v8 }
 0x19c   : > { %v1529_v9 = vld [vmem:[%s713_s24] sm:$0xf]  ;;  %v1531_v10 = vld [vmem:[%s713_s24 + $0x4] sm:$0xf] }
 0x19d   : > { %1530 = vst [vmem:[%s1513_s27] sm:$0xf] %v1529_v9  ;;  %1532 = vst [vmem:[%s1513_s27 + $0x8] sm:$0xf] %v1531_v10 }
 0x1a2   : > { %v1533_v11 = vld [vmem:[%s713_s24 + $0x8] sm:$0xf] }
 0x1a3   : > { %1534 = vst [vmem:[%s1513_s27 + $0x10] sm:$0xf] %v1533_v11 }
 0x1a4 PF: > { %p10_p10 = scmp.ge.s32.totalorder %s2086_s16, 4   ;;  %s2512_s12 = smov %s2042_s13 }
 0x1a5   : > { %s2513_s13 = smov %s2097_s19  ;;  %s2514_s14 = smov %s2086_s16 }
 0x1a6   :  { %12 = sbr.rel (!%p10_p10) target bundleno = 2 (0x2), region = 152 }

// kernel: cnn_forward.5
= control target key start
LH: loop header
LB: loop body
LE: loop exit
PB: predicated region body
PF: predicated region fallthrough
CT: control target
= control target key end

     0   :  { %v530_v1 = vmov 0.0   ;;  %vm531_vm0 = vmmov 0   ;;  %vm207_vm1 = vcmask 523264   ;;  %s669_s1 = inlined_call_operand.vmem [shape: bf16[320,64], index: 1, kind: input, shape index: {}]   ;;  %s670_s0 = inlined_call_operand.vmem [shape: bf16[16,320], index: 0, kind: input, shape index: {}]   ;;  %s671_s3 = inlined_call_operand.vmem [shape: bf16[64,128], index: 3, kind: input, shape index: {}]   ;;  %s672_s2 = inlined_call_operand.vmem [shape: f32[1,64], index: 2, kind: input, shape index: {}]   ;;  %s673_s4 = inlined_call_operand.vmem [shape: f32[1,128], index: 4, kind: input, shape index: {}]   ;;  %s674_s5 = inlined_call_operand.vmem [shape: f32[16,128], index: 5, kind: output, shape index: {}]  }
   0x1   :  { %v494_v0 = vld [vmem:[%s669_s1 + $0x40] sm:$0xff]   ;;  %468 = vmatprep.subr.bf16.mxu1 %v530_v1  ;;  %476 = vmatprep.mubr.msk.bf16.mxu1 %vm531_vm0, %v530_v1  ;;  %v496_v3 = vld [vmem:[%s669_s1 + $0x48] sm:$0xff]   ;;  %v498_v5 = vld [vmem:[%s669_s1 + $0x50] sm:$0xff]  }
   0x2   :  { %v495_v2 = vld [vmem:[%s669_s1] sm:$0xff]   ;;  %436 = vmatprep.subr.bf16.mxu0 %v494_v0  ;;  %v497_v4 = vld [vmem:[%s669_s1 + $0x8] sm:$0xff]   ;;  %v499_v6 = vld [vmem:[%s669_s1 + $0x10] sm:$0xff]  }
   0x3   :  { %437 = vmatpush3.bf16.msra.mxu0 %v495_v2  ;;  %v500_v7 = vld [vmem:[%s669_s1 + $0x58] sm:$0xff]   ;;  %v504_v8 = vld [vmem:[%s669_s1 + $0x80] sm:$0xff]   ;;  %v507_v11 = vld [vmem:[%s669_s1 + $0x88] sm:$0xff]  }
   0x4   :  { %438 = vmatprep.subr.bf16.mxu0 %v496_v3  ;;  %v501_v9 = vld [vmem:[%s669_s1 + $0x18] sm:$0xff]   ;;  %v502_v10 = vld [vmem:[%s669_s1 + $0x60] sm:$0xff]   ;;  %469 = vmatpush3.bf16.msra.mxu1 %v504_v8  ;;  %v505_v13 = vld [vmem:[%s669_s1 + $0x68] sm:$0xff]  }
   0x5   :  { %470 = vmatprep.subr.bf16.mxu1 %v530_v1  ;;  %v503_v12 = vld [vmem:[%s669_s1 + $0x20] sm:$0xff]   ;;  %v510_v14 = vld [vmem:[%s669_s1 + $0x90] sm:$0xff]   ;;  %v506_v15 = vld [vmem:[%s669_s1 + $0x28] sm:$0xff]  }
   0x6   :  { %v508_v16 = vld [vmem:[%s669_s1 + $0x70] sm:$0xff]   ;;  %v516_v19 = vld [vmem:[%s669_s1 + $0x98] sm:$0xff]   ;;  %v518_v22 = vld [vmem:[%s671_s3] sm:$0xff]  }
   0x7   :  { %439 = vmatpush3.bf16.msra.mxu0 %v497_v4  ;;  %v515_v17 = vld [vmem:[%s670_s0 + $0x4] ss:$12 sps:$4 sm:$0xff]   ;;  %v511_v20 = vld [vmem:[%s669_s1 + $0x78] sm:$0xff]   ;;  %v517_v21 = vld [vmem:[%s670_s0 + $0x8] ss:$12 sps:$4 sm:$0xff]  }
   0x8   :  { %440 = vmatprep.subr.bf16.mxu0 %v498_v5  ;;  %471 = vmatpush3.bf16.msra.mxu1 %v507_v11  ;;  %v509_v18 = vld [vmem:[%s669_s1 + $0x30] sm:$0xff]   ;;  %v512_v23 = vld [vmem:[%s669_s1 + $0x38] sm:$0xff]   ;;  %v513_v24 = vld [vmem:[%s670_s0] ss:$12 sps:$4 sm:$0xff]  }
   0x9   :  { %472 = vmatprep.subr.bf16.mxu1 %v530_v1  ;;  %243 = vmatprep.mubr.bf16.mxu0 %v515_v17  ;;  %v519_v25 = vld [vmem:[%s671_s3 + $0x8] sm:$0xff]   ;;  %v520_v26 = vld [vmem:[%s671_s3 + $0x10] sm:$0xff]   ;;  %v521_v27 = vld [vmem:[%s671_s3 + $0x18] sm:$0xff]  }
   0xa   :  { %v405_v34 = vld [vmem:[%s672_s2] ss:$0 sm:$0xff] }
   0xb   :  { %441 = vmatpush3.bf16.msra.mxu0 %v499_v6  ;;  %v430_v46 = vld [vmem:[%s673_s4] ss:$0 sm:$0xff] }
   0xc   :  { %442 = vmatprep.subr.bf16.mxu0 %v500_v7  ;;  %473 = vmatpush3.bf16.msra.mxu1 %v510_v14 }
   0xd   :  { %474 = vmatprep.subr.bf16.mxu1 %v530_v1 }
   0xf   :  { %443 = vmatpush3.bf16.msra.mxu0 %v501_v9 }
  0x10   :  { %444 = vmatprep.subr.bf16.mxu0 %v502_v10  ;;  %475 = vmatpush3.bf16.msra.mxu1 %v516_v19 }
  0x11   :  { %480 = vmatprep.subr.bf16.mxu1 %v530_v1 }
  0x13   :  { %445 = vmatpush3.bf16.msra.mxu0 %v503_v12  ;;  %477 = vmatmul.mubr.msk.bf16.vlgmr.msra.gmra.mrb[0].mxu1 %vm207_vm1, %v517_v21 }
  0x14   :  { %446 = vmatprep.subr.bf16.mxu0 %v505_v13  ;;  %481 = vmatpush3.bf16.msra.mxu1 %v518_v22 }
  0x15   :  { %482 = vmatprep.subr.bf16.mxu1 %v530_v1  ;;  %488 = vmatprep.mubr.msk.bf16.mxu1 %vm531_vm0, %v530_v1 }
  0x17   :  { %447 = vmatpush3.bf16.msra.mxu0 %v506_v15 }
  0x18   :  { %448 = vmatprep.subr.bf16.mxu0 %v508_v16  ;;  %483 = vmatpush3.bf16.msra.mxu1 %v519_v25 }
  0x19   :  { %484 = vmatprep.subr.bf16.mxu1 %v530_v1 }
  0x1b   :  { %449 = vmatpush3.bf16.msra.mxu0 %v509_v18 }
  0x1c   :  { %450 = vmatprep.subr.bf16.mxu0 %v511_v20  ;;  %485 = vmatpush3.bf16.msra.mxu1 %v520_v26 }
  0x1d   :  { %486 = vmatprep.subr.bf16.mxu1 %v530_v1 }
  0x1f   :  { %451 = vmatpush3.bf16.msra.mxu0 %v512_v23 }
  0x20   :  { %487 = vmatpush3.bf16.msra.mxu1 %v521_v27 }
  0x22   :  { %244 = vmatmul.mubr.bf16.vlgmr.msra.gmra.mrb[0].mxu0 %v513_v24 }
  0xe6   :  { %v286_v28 = vpop.f32.mrb[0].mxu1 }
  0xe7   :  { %v478_v29 = vpop.f32.mrb[1].mxu1 }
  0xe8   :  { %v289_v30 = vpop.f32.mrb[2].mxu1 }
  0xe9   :  { %v479_v31 = vpop.f32.mrb[3].mxu1 }
  0xf5   :  { %v452_v32 = vpop.f32.mrb[0].mxu0 }
  0xf6   :  { %v453_v33 = vpop.f32.mrb[1].mxu0 }
  0xf7   :  { %v454_v35 = vadd.f32 %v453_v33, %v452_v32  ;;  %v455_v36 = vpop.f32.mrb[2].mxu0 }
  0xf8   :  { %v456_v37 = vpop.f32.mrb[3].mxu0 }
  0xf9   :  { %v246_v38 = vadd.f32 %v454_v35, %v405_v34  ;;  %v457_v39 = vadd.f32 %v456_v37, %v455_v36 }
  0xfb   :  { %v287_v40 = vadd.f32 %v286_v28, %v246_v38  ;;  %v249_v41 = vadd.f32 %v457_v39, %v405_v34 }
  0xfd   :  { %v290_v42 = vadd.f32 %v289_v30, %v249_v41  ;;  %v293_v43 = vmax.f32 %v287_v40, 0.0 }
  0xff   :  { %v294_v44 = vmax.f32 %v290_v42, 0.0 }
 0x101   :  { %v295_v45 = vpack.c.bf16 %v294_v44, %v293_v43 }
 0x103   :  { %489 = vmatmul.mubr.msk.bf16.vlgmr.msra.gmra.mrb[4].mxu1 %vm207_vm1, %v295_v45 }
 0x1d6   :  { %v372_v47 = vpop.f32.mrb[4].mxu1 }
 0x1d7   :  { %v373_v48 = vadd.f32 %v430_v46, %v372_v47  ;;  %v490_v49 = vpop.f32.mrb[5].mxu1 }
 0x1d8   :  { %v375_v50 = vpop.f32.mrb[6].mxu1 }
 0x1d9   :  { %379 = vmax.xlane.f32.xlu0 %v373_v48  ;;  %v491_v51 = vpop.f32.mrb[7].mxu1  ;;  %v376_v52 = vadd.f32 %v430_v46, %v375_v50 }
 0x1dd   :  { %381 = vmax.xlane.f32.xlu0 %v376_v52 }
 0x266   :  { %v380_v53 = vpop.xlane.xlu0 %379 }
 0x267   :  { %v383_v54 = vsub.f32 %v373_v48, %v380_v53 }
 0x269   :  { %v385_v55 = vmul.f32 1.442695, %v383_v54 }
 0x26a   :  { %v382_v56 = vpop.xlane.xlu0 %381 }
 0x26b   :  { %v384_v57 = vsub.f32 %v376_v52, %v382_v56  ;;  %522 = vpow2.f32 %v385_v55 }
 0x26d   :  { %v387_v58 = vmul.f32 1.442695, %v384_v57 }
 0x26f   :  { %524 = vpow2.f32 %v387_v58 }
 0x275   :  { %v523_v59 = vpop.eup %522 }
 0x276   :  { %389 = vadd.xlane.f32.xlu1 %v523_v59 }
 0x279   :  { %v525_v60 = vpop.eup %524 }
 0x27a   :  { %391 = vadd.xlane.f32.xlu1 %v525_v60 }
 0x303   :  { %v390_v61 = vpop.xlane.xlu1 %389 }
 0x304   :  { %526 = vlog2.f32 %v390_v61 }
 0x307   :  { %v392_v62 = vpop.xlane.xlu1 %391 }
 0x308   :  { %528 = vlog2.f32 %v392_v62 }
 0x30e   :  { %v527_v63 = vpop.eup %526 }
 0x30f   :  { %v394_v0 = vmul.f32 0.6931472, %v527_v63 }
 0x311   :  { %v397_v1 = vsub.f32 %v383_v54, %v394_v0 }
 0x312   :  { %v529_v2 = vpop.eup %528 }
 0x313   :  { %399 = vst [vmem:[%s674_s5] sm:$0xff] %v397_v1  ;;  %v396_v3 = vmul.f32 0.6931472, %v529_v2 }
 0x315   :  { %v398_v4 = vsub.f32 %v384_v57, %v396_v3 }
 0x317   :  { %400 = vst [vmem:[%s674_s5 + $0x8] sm:$0xff] %v398_v4 }

</bundles_post_ra>
